<compile_context>
chip_gen: v5e
topology: v5e:2x2
jax: 0.10.0
libtpu: 0.0.40
codegen_flags: <defaults>
</compile_context>

<pallas_src>
import functools

import jax
import jax.numpy as jnp
import numpy as np
from jax import lax
from jax.experimental import pallas as pl
from jax.experimental.pallas import tpu as pltpu

EPS = 1e-5


# --------------------------------------------------------------------------
# Small in-kernel helpers
# --------------------------------------------------------------------------
def _rowsum_lanes(x):
    """(N, K) f32 -> (1, N) lane-dense row of per-row sums (via one MXU push)."""
    ones8 = jnp.ones((8, x.shape[1]), jnp.float32)
    r8 = lax.dot_general(ones8, x, (((1,), (1,)), ((), ())),
                         preferred_element_type=jnp.float32)
    return r8[0:1, :]


def _masked_stats_lanes(h, i, n_valid, n_tile):
    """h is (H, NT) lane-dense.  Returns (2H, 1) = [sum; sum-of-squares] over
    the valid (non-padded) columns of this tile."""
    cols = lax.broadcasted_iota(jnp.int32, (1, n_tile), 1) + i * n_tile
    hm = jnp.where(cols < n_valid, h, 0.0)
    return jnp.concatenate(
        [jnp.sum(hm, axis=1, keepdims=True),
         jnp.sum(hm * hm, axis=1, keepdims=True)], axis=0)


# --------------------------------------------------------------------------
# Pass 1: FM (first + second order) and linear_1 pre-activation + stats
# --------------------------------------------------------------------------
def _fm_h1_kernel(e1s_ref, e2_ref, xv_ref, r_ref, m_ref, w1_ref, b1_ref,
                  fm_ref, h1_ref, s1_ref, *, n_valid, n_tile):
    i = pl.program_id(0)
    f32 = jnp.float32
    mx_dtype = e2_ref.dtype

    xv = xv_ref[...]                                              # (NT, F) f32
    xv_e = jnp.dot(xv, r_ref[...], preferred_element_type=f32)    # (NT, FE)

    # v2 = e2 * Xv (expanded); scaled in f32 (v5e-safe VPU), fed to the MXU in
    # the streamed dtype (bf16 operands in bf16 mode).
    v2_f32 = e2_ref[...].astype(f32) * xv_e
    v2_mx = v2_f32.astype(mx_dtype)

    # FM second order without reshapes: M[a,b] = 1 iff columns a, b share the
    # same embedding index  =>  sum_e s_e^2 - sum_a v2_a^2 = rowsum(v2*(v2@M - v2)).
    v2m = jnp.dot(v2_mx, m_ref[...], preferred_element_type=f32)  # (NT, FE)
    fm2 = _rowsum_lanes(v2_f32 * (v2m - v2_f32))                  # (1, NT)
    # FM first order from the pre-summed first-order embeddings (streamed (NT, F)).
    fm1 = _rowsum_lanes(xv * e1s_ref[...])                        # (1, NT)
    fm_ref[...] = fm1 + 0.5 * fm2                                 # lane-dense

    # Deep layer 1 (pre-BatchNorm), lane-dense (H1, NT): h1 = W1^T v2^T + b1.
    h1 = lax.dot_general(w1_ref[...], v2_mx, (((1,), (1,)), ((), ())),
                         preferred_element_type=f32) + b1_ref[...]
    h1s = h1.astype(h1_ref.dtype)
    h1_ref[...] = h1s
    s1_ref[0] = _masked_stats_lanes(h1s.astype(f32), i, n_valid, n_tile)


# --------------------------------------------------------------------------
# Middle pass: BatchNorm_k (precomputed affine) + linear_{k+1} + stats
# --------------------------------------------------------------------------
def _bn_linear_kernel(h_ref, sc_ref, sh_ref, w_ref, b_ref, o_ref, so_ref,
                      *, n_valid, n_tile):
    i = pl.program_id(0)
    f32 = jnp.float32
    h = h_ref[...].astype(f32)                      # (H_in, NT) lane-dense
    hn = h * sc_ref[...] + sh_ref[...]              # BN with precomputed scale/shift
    h_next = lax.dot_general(w_ref[...], hn.astype(w_ref.dtype),
                             (((1,), (0,)), ((), ())),
                             preferred_element_type=f32) + b_ref[...]
    hs = h_next.astype(o_ref.dtype)                 # (H_out, NT)
    o_ref[...] = hs
    so_ref[0] = _masked_stats_lanes(hs.astype(f32), i, n_valid, n_tile)


# --------------------------------------------------------------------------
# Final pass: BN_L folded into a row vector + per-row reduction + FM + bias
# --------------------------------------------------------------------------
def _bn_reduce_kernel(h_ref, a_ref, fm_ref, bias_ref, o_ref):
    f32 = jnp.float32
    # sum_j BN(h)_j = a . h[:, n] + const, const already folded into bias_ref.
    a8 = jnp.broadcast_to(a_ref[...], (8, a_ref.shape[1]))        # (8, H)
    deep8 = lax.dot_general(a8, h_ref[...].astype(f32),
                            (((1,), (0,)), ((), ())),
                            preferred_element_type=f32)           # (8, NT)
    o_ref[...] = deep8[0:1, :] + fm_ref[...] + bias_ref[...]


# --------------------------------------------------------------------------
# Wrapper helpers: tiling, BlockSpecs, cross-tile stat reduction
# --------------------------------------------------------------------------
def _row_block(cols, n_tile):
    return pl.BlockSpec((n_tile, cols), lambda i: (i, 0))


def _col_block(rows, n_tile):
    return pl.BlockSpec((rows, n_tile), lambda i: (0, i))


def _lane_block(n_tile):
    return pl.BlockSpec((1, n_tile), lambda i: (0, i))


def _resident(arr):
    return pl.BlockSpec(arr.shape, lambda i, _nd=arr.ndim: (0,) * _nd)


def _stats_block(hdim):
    return pl.BlockSpec((1, 2 * hdim, 1), lambda i: (i, 0, 0))


def _nbytes(*arrs):
    return int(sum(int(np.prod(a.shape)) * a.dtype.itemsize for a in arrs))


def _pick_n_tile(n, requested, fe):
    """Multiple of 128; keep >= 2 grid steps (v7x megacore); cap by VMEM need."""
    req = max(128, (int(requested) // 128) * 128)
    half = -(-((n + 1) // 2) // 128) * 128           # ceil(n/2) rounded up to 128
    t = max(128, min(req, half))
    # keep the streamed e2 double-buffer comfortably inside the scoped budget
    cap = max(128, ((24 << 20) // max(1, fe * 4 * 6)) // 128 * 128)
    return max(128, min(t, cap))


def _bn_affine(stats, gamma, beta, n_valid):
    """Full-batch BN folded into a per-feature (scale, shift) pair (f32, host XLA)."""
    g_vec = gamma.reshape(-1)
    b_vec = beta.reshape(-1)
    hdim = g_vec.shape[0]
    mu = stats[:hdim, 0] / n_valid
    # TODO(synk): E[x^2]-E[x]^2 in f32 can cancel for very large batches /
    # activations; acceptable here, consider a shifted accumulation for huge N.
    var = stats[hdim:, 0] / n_valid - mu * mu
    scale = g_vec * lax.rsqrt(var + EPS)
    shift = b_vec - mu * scale
    return scale.reshape(hdim, 1), shift.reshape(hdim, 1)


def deepfm_pallas_forward(e1sum, e2, xv, bias, deep_params, *, emb_size,
                          n_tile=1024, stream_dtype=jnp.float32):
    n, fe = e2.shape
    n_fields = xv.shape[1]
    assert fe == n_fields * emb_size
    assert e1sum.shape == (n, n_fields)

    f32 = jnp.float32
    act_dtype = stream_dtype          # inter-pass activations follow stream dtype

    n_tile = _pick_n_tile(n, n_tile, fe)
    g = -(-n // n_tile)
    n_pad = g * n_tile
    pad = n_pad - n

    # TODO(synk): when n % n_tile != 0 the streamed inputs are padded host-side
    # (one extra HBM round trip of e2); production callers should pick a batch
    # that is a multiple of n_tile or handle the ragged tail in-kernel.
    def prep(x, dtype):
        x = x.astype(dtype)
        return jnp.pad(x, ((0, pad), (0, 0))) if pad else x

    e1sp = prep(e1sum, f32)
    xvp = prep(xv, f32)               # Xv always f32: tiny stream, large accuracy effect
    e2p = prep(e2, stream_dtype)

    bias_row = bias.reshape(1, n).astype(f32)
    if pad:
        bias_row = jnp.pad(bias_row, ((0, 0), (0, pad)))

    # Tiny resident constants: R expands (N,F)->(N,FE); M marks same-embedding
    # column pairs (0/1, exact in bf16).
    R = jnp.repeat(jnp.eye(n_fields, dtype=f32), emb_size, axis=1)        # (F, FE)
    Ms = jnp.tile(jnp.eye(emb_size, dtype=f32),
                  (n_fields, n_fields)).astype(stream_dtype)              # (FE, FE)

    w1, b1, g1, be1 = deep_params[0]
    h1d = w1.shape[1]
    w1t = w1.T.astype(stream_dtype)               # (H1, FE) — pre-transposed
    b1c = b1.reshape(-1, 1).astype(f32)           # (H1, 1)

    e2_it = np.dtype(stream_dtype).itemsize
    act_it = np.dtype(act_dtype).itemsize
    blk_bytes = n_tile * (fe * e2_it + 8 * n_fields + h1d * act_it + 4)
    resid_bytes = _nbytes(R, Ms, w1t, b1c)
    vmem_limit = int(min(48 << 20, max(32 << 20, 3 * blk_bytes + resid_bytes + (8 << 20))))
    cparams = pltpu.CompilerParams(dimension_semantics=("parallel",),
                                   vmem_limit_bytes=vmem_limit)

    # ---- pass 1: FM + linear_1 + per-tile stats ----------------------------
    flops1 = int(2 * n_pad * fe * (n_fields + fe + h1d + 4))
    bytes1 = (_nbytes(e1sp, e2p, xvp, R, Ms, w1t, b1c)
              + 4 * n_pad + act_it * n_pad * h1d + 8 * g * h1d)
    fm, h, s_part = pl.pallas_call(
        functools.partial(_fm_h1_kernel, n_valid=n, n_tile=n_tile),
        grid=(g,),
        in_specs=[_row_block(n_fields, n_tile),      # e1sum (NT, F)
                  _row_block(fe, n_tile),            # e2    (NT, FE)
                  _row_block(n_fields, n_tile),      # Xv    (NT, F)
                  _resident(R), _resident(Ms), _resident(w1t), _resident(b1c)],
        out_specs=[_lane_block(n_tile),              # FM    (1, N) lane-dense
                   _col_block(h1d, n_tile),          # h1    (H1, N) lane-dense
                   _stats_block(h1d)],               # per-tile (2*H1, 1) partials
        out_shape=[jax.ShapeDtypeStruct((1, n_pad), f32),
                   jax.ShapeDtypeStruct((h1d, n_pad), act_dtype),
                   jax.ShapeDtypeStruct((g, 2 * h1d, 1), f32)],
        compiler_params=cparams,
        cost_estimate=pl.CostEstimate(flops=flops1, transcendentals=0,
                                      bytes_accessed=int(bytes1)),
    )(e1sp, e2p, xvp, R, Ms, w1t, b1c)
    stats = jnp.sum(s_part, axis=0)                  # (2*H1, 1) full-batch sums
    gamma, beta = g1, be1

    # ---- middle passes: BN_k (precomputed affine) + linear_{k+1} + stats ----
    for k in range(1, len(deep_params)):
        w_next, b_next, g_next, be_next = deep_params[k]
        h_in, h_out = h.shape[0], w_next.shape[1]
        scale_c, shift_c = _bn_affine(stats, gamma, beta, n)      # (H_in, 1)
        wt = w_next.T.astype(stream_dtype)            # (H_out, H_in)
        bc = b_next.reshape(-1, 1).astype(f32)        # (H_out, 1)
        flopsk = int(2 * n_pad * h_in * h_out + 6 * n_pad * h_in)
        bytesk = (_nbytes(h, scale_c, shift_c, wt, bc)
                  + act_it * n_pad * h_out + 8 * g * h_out)
        h, s_part = pl.pallas_call(
            functools.partial(_bn_linear_kernel, n_valid=n, n_tile=n_tile),
            grid=(g,),
            in_specs=[_col_block(h_in, n_tile), _resident(scale_c),
                      _resident(shift_c), _resident(wt), _resident(bc)],
            out_specs=[_col_block(h_out, n_tile), _stats_block(h_out)],
            out_shape=[jax.ShapeDtypeStruct((h_out, n_pad), act_dtype),
                       jax.ShapeDtypeStruct((g, 2 * h_out, 1), f32)],
            compiler_params=cparams,
            cost_estimate=pl.CostEstimate(flops=flopsk, transcendentals=0,
                                          bytes_accessed=int(bytesk)),
        )(h, scale_c, shift_c, wt, bc)
        stats = jnp.sum(s_part, axis=0)
        gamma, beta = g_next, be_next

    # ---- final pass: BN_L folded into (a, const) + reduction + FM + bias ----
    h_out = h.shape[0]
    scale_c, shift_c = _bn_affine(stats, gamma, beta, n)
    a_row = scale_c.reshape(1, h_out)                 # (1, H)
    bias_c = bias_row + jnp.sum(shift_c)              # fold sum_j shift_j into bias
    flopsf = int(2 * n_pad * h_out + 4 * n_pad)
    bytesf = _nbytes(h, a_row, fm, bias_c) + 4 * n_pad
    out = pl.pallas_call(
        _bn_reduce_kernel,
        grid=(g,),
        in_specs=[_col_block(h_out, n_tile), _resident(a_row),
                  _lane_block(n_tile), _lane_block(n_tile)],
        out_specs=_lane_block(n_tile),
        out_shape=jax.ShapeDtypeStruct((1, n_pad), f32),
        compiler_params=cparams,
        cost_estimate=pl.CostEstimate(flops=flopsf, transcendentals=0,
                                      bytes_accessed=int(bytesf)),
    )(h, a_row, fm, bias_c)
    return out[0, :n]


# --------------------------------------------------------------------------
# Glue: parameter init + per-field embedding construction (host-side gathers)
# --------------------------------------------------------------------------
def init_params(key, feature_sizes, n_dense, emb_size, hidden_dims):
    F = len(feature_sizes)
    keys = iter(jax.random.split(key, 8 * F + 8 * len(hidden_dims) + 16))

    def nrm(shape, scale=0.1):
        return (scale * jax.random.normal(next(keys), shape)).astype(jnp.float32)

    params = {}
    # first / second order models: Linear(feat_size -> E) for dense fields,
    # Embedding(feat_size, E) for sparse fields.
    for order in ("fo", "so"):
        dense, sparse = [], []
        for i, fs in enumerate(feature_sizes):
            if i < n_dense:
                dense.append((nrm((emb_size, fs)), nrm((emb_size,))))   # (W, b)
            else:
                sparse.append(nrm((fs, emb_size)))                       # table
        params[order + "_dense"] = dense
        params[order + "_sparse"] = sparse

    # deep layers: linear_i (stored as (in, out)) + batchnorm affine params
    all_dims = [F * emb_size] + list(hidden_dims)
    deep = []
    for i in range(len(hidden_dims)):
        d_in, d_out = all_dims[i], all_dims[i + 1]
        deep.append((nrm((d_in, d_out)),
                     nrm((1, d_out)),
                     1.0 + nrm((1, d_out)),      # gamma
                     nrm((1, d_out))))           # beta
    params["deep"] = deep
    return params


def build_field_embs(Xi, dense_params, sparse_params, n_dense):
    """Concatenate per-field (N, E) embeddings -> (N, F*E), field-major.

    TODO(synk): the sparse-table gathers stay host-side XLA gathers; fusing
    them into the kernel (tables in HBM + scalar-prefetched indices + DMA
    gather) would remove one full HBM round trip of the (N, F*E) activations.
    """
    outs = []
    for i, (w, b) in enumerate(dense_params):
        xi = Xi[:, i, :].astype(jnp.float32)            # (N, 1)
        outs.append(xi @ w.T + b)                       # (N, E)
    for j, tbl in enumerate(sparse_params):
        i = n_dense + j
        idx = Xi[:, i, 0].astype(jnp.int32)             # (N,)
        outs.append(tbl[idx])                           # (N, E)
    return jnp.concatenate(outs, axis=1)


def build_first_order_sums(Xi, dense_params, sparse_params, n_dense):
    """First-order embeddings pre-summed over E -> (N, F).

    fm_first only enters the model as sum_e e1[n,f,e] * Xv[n,f], so the sum
    over E is folded into the tables / dense weights (linear, exact); this
    shrinks the pass-1 HBM stream for the first-order part by a factor E.
    """
    outs = []
    for i, (w, b) in enumerate(dense_params):
        xi = Xi[:, i, :].astype(jnp.float32)             # (N, 1)
        w_sum = jnp.sum(w, axis=0).reshape(-1, 1)        # (fs, 1)
        outs.append(xi @ w_sum + jnp.sum(b))             # (N, 1)
    for j, tbl in enumerate(sparse_params):
        i = n_dense + j
        idx = Xi[:, i, 0].astype(jnp.int32)
        outs.append(jnp.sum(tbl, axis=1)[idx][:, None])  # (N, 1)
    return jnp.concatenate(outs, axis=1)


def deepfm_forward(Xi, Xv, params, bias, *, n_dense, emb_size,
                   n_tile=1024, stream_dtype=jnp.float32):
    e1sum = build_first_order_sums(Xi, params["fo_dense"], params["fo_sparse"], n_dense)
    e2 = build_field_embs(Xi, params["so_dense"], params["so_sparse"], n_dense)
    return deepfm_pallas_forward(e1sum, e2, Xv.astype(jnp.float32), bias,
                                 params["deep"], emb_size=emb_size,
                                 n_tile=n_tile, stream_dtype=stream_dtype)


# Pure-JAX reference (mirrors the PyTorch forward) for correctness checking.
def deepfm_reference(Xi, Xv, params, bias, n_dense, emb_size):
    N, F, _ = Xi.shape
    e1 = build_field_embs(Xi, params["fo_dense"], params["fo_sparse"], n_dense)
    e2 = build_field_embs(Xi, params["so_dense"], params["so_sparse"], n_dense)
    xv_rep = jnp.repeat(Xv.astype(jnp.float32), emb_size, axis=1)
    v1 = e1 * xv_rep
    v2 = e2 * xv_rep
    fm_first = jnp.sum(v1, axis=1)
    v2_fields = v2.reshape(N, F, emb_size)
    s = jnp.sum(v2_fields, axis=1)
    sq = jnp.sum(v2_fields * v2_fields, axis=1)
    fm_second = jnp.sum(0.5 * (s * s - sq), axis=1)
    h = v2
    for (w, b, gm, bt) in params["deep"]:
        h = h @ w + b
        mu = jnp.mean(h, axis=0, keepdims=True)
        var = jnp.mean((h - mu) ** 2, axis=0, keepdims=True)
        h = (h - mu) / jnp.sqrt(var + EPS) * gm + bt
    return fm_first + fm_second + jnp.sum(h, axis=1) + bias


if __name__ == "__main__":
    # Small shapes consistent with the module; N exercises tiling + masking
    # (N=200 -> 2 tiles of 128 with a masked ragged tail).
    N = 200
    n_dense, n_sparse = 3, 5
    feature_sizes = [1, 1, 1, 10, 20, 30, 40, 50]   # dense fields are size 1
    F = len(feature_sizes)
    E = 4                                            # embedding_size
    hidden_dims = [32, 32]

    key = jax.random.PRNGKey(0)
    k_par, k_xid, k_xis, k_xv, k_bias = jax.random.split(key, 5)

    params = init_params(k_par, feature_sizes, n_dense, E, hidden_dims)

    # Xi: dense float values + sparse integer indices (stored as float).
    xi_dense = jax.random.normal(k_xid, (N, n_dense, 1), dtype=jnp.float32)
    sparse_cols = []
    for j, fs in enumerate(feature_sizes[n_dense:]):
        kk = jax.random.fold_in(k_xis, j)
        sparse_cols.append(jax.random.randint(kk, (N, 1, 1), 0, fs).astype(jnp.float32))
    xi_sparse = jnp.concatenate(sparse_cols, axis=1)
    Xi = jnp.concatenate([xi_dense, xi_sparse], axis=1)        # (N, F, 1)
    Xv = jax.random.normal(k_xv, (N, F), dtype=jnp.float32)    # (N, F)

    # TODO(synk): the PyTorch forward draws a fresh torch.randn bias every call
    # (non-deterministic); here it is a fixed deterministic random vector.
    bias = jax.random.normal(k_bias, (N,), dtype=jnp.float32)

    # ---- f32 streaming: exact check against the pure-JAX reference ---------
    fwd = jax.jit(functools.partial(deepfm_forward, n_dense=n_dense, emb_size=E,
                                    n_tile=1024, stream_dtype=jnp.float32))
    out = jax.block_until_ready(fwd(Xi, Xv, params, bias))
    ref = deepfm_reference(Xi, Xv, params, bias, n_dense, E)
    assert out.shape == (N,)
    np.testing.assert_allclose(np.asarray(out), np.asarray(ref), rtol=1e-4, atol=1e-4)

    # ---- bf16 streaming of e2 / weights / inter-pass h (bandwidth mode) ----
    fwd_bf16 = jax.jit(functools.partial(deepfm_forward, n_dense=n_dense, emb_size=E,
                                         n_tile=1024, stream_dtype=jnp.bfloat16))
    out_bf16 = jax.block_until_ready(fwd_bf16(Xi, Xv, params, bias))
    assert out_bf16.shape == (N,)
    assert bool(np.all(np.isfinite(np.asarray(out_bf16))))
    np.testing.assert_allclose(np.asarray(out_bf16), np.asarray(ref),
                               rtol=1e-1, atol=5e-1)

    print("KERNEL_OK")
</pallas_src>

<mosaic_0001>
module attributes {stable_mosaic.version = 11 : i64} {
  func.func @_fm_h1_kernel(%arg0: i32, %arg1: memref<128x8xf32, #tpu.memory_space<vmem>>, %arg2: memref<128x32xf32, #tpu.memory_space<vmem>>, %arg3: memref<128x8xf32, #tpu.memory_space<vmem>>, %arg4: memref<8x32xf32, #tpu.memory_space<vmem>>, %arg5: memref<32x32xf32, #tpu.memory_space<vmem>>, %arg6: memref<32x32xf32, #tpu.memory_space<vmem>>, %arg7: memref<32x1xf32, #tpu.memory_space<vmem>>, %arg8: memref<1x128xf32, #tpu.memory_space<vmem>>, %arg9: memref<32x128xf32, #tpu.memory_space<vmem>>, %arg10: memref<1x64x1xf32, #tpu.memory_space<vmem>>) attributes {dimension_semantics = [#tpu.dimension_semantics<parallel>], iteration_bounds = array<i64: 2>, scalar_prefetch = 0 : i64, scratch_operands = 0 : i64, tpu.core_type = #tpu.core_type<tc>, window_params = [{transform_indices = @transform_0, window_bounds = array<i64: 128, 8>}, {transform_indices = @transform_1, window_bounds = array<i64: 128, 32>}, {transform_indices = @transform_2, window_bounds = array<i64: 128, 8>}, {pipeline_mode = #tpu.pipeline_mode<synchronous>, transform_indices = @transform_3, window_bounds = array<i64: 8, 32>}, {pipeline_mode = #tpu.pipeline_mode<synchronous>, transform_indices = @transform_4, window_bounds = array<i64: 32, 32>}, {pipeline_mode = #tpu.pipeline_mode<synchronous>, transform_indices = @transform_5, window_bounds = array<i64: 32, 32>}, {pipeline_mode = #tpu.pipeline_mode<synchronous>, transform_indices = @transform_6, window_bounds = array<i64: 32, 1>}, {transform_indices = @transform_7, window_bounds = array<i64: 1, 128>}, {transform_indices = @transform_8, window_bounds = array<i64: 32, 128>}, {transform_indices = @transform_9, window_bounds = array<i64: 1, 64, 1>}]} {
    %c0 = arith.constant 0 : index
    %c0_0 = arith.constant 0 : index
    %0 = vector.load %arg3[%c0, %c0_0] : memref<128x8xf32, #tpu.memory_space<vmem>>, vector<128x8xf32>
    %c0_1 = arith.constant 0 : index
    %c0_2 = arith.constant 0 : index
    %1 = vector.load %arg4[%c0_1, %c0_2] : memref<8x32xf32, #tpu.memory_space<vmem>>, vector<8x32xf32>
    %cst = arith.constant dense<0.000000e+00> : vector<128x32xf32>
    %2 = tpu.matmul %0, %1, %cst {dimension_numbers = #tpu.dot_dimension_numbers<[1], [0], [0], [1], [0, 0, 1, 1], [], []>} : vector<128x8xf32>, vector<8x32xf32>, vector<128x32xf32> -> vector<128x32xf32>
    %c0_3 = arith.constant 0 : index
    %c0_4 = arith.constant 0 : index
    %3 = vector.load %arg2[%c0_3, %c0_4] : memref<128x32xf32, #tpu.memory_space<vmem>>, vector<128x32xf32>
    %4 = arith.mulf %3, %2 : vector<128x32xf32>
    %c0_5 = arith.constant 0 : index
    %c0_6 = arith.constant 0 : index
    %5 = vector.load %arg5[%c0_5, %c0_6] : memref<32x32xf32, #tpu.memory_space<vmem>>, vector<32x32xf32>
    %cst_7 = arith.constant dense<0.000000e+00> : vector<128x32xf32>
    %6 = tpu.matmul %4, %5, %cst_7 {dimension_numbers = #tpu.dot_dimension_numbers<[1], [0], [0], [1], [0, 0, 1, 1], [], []>} : vector<128x32xf32>, vector<32x32xf32>, vector<128x32xf32> -> vector<128x32xf32>
    %7 = arith.subf %6, %4 : vector<128x32xf32>
    %8 = arith.mulf %4, %7 : vector<128x32xf32>
    %cst_8 = arith.constant 1.000000e+00 : f32
    %9 = vector.broadcast %cst_8 : f32 to vector<8x32xf32>
    %cst_9 = arith.constant dense<0.000000e+00> : vector<8x128xf32>
    %10 = tpu.matmul %9, %8, %cst_9 {dimension_numbers = #tpu.dot_dimension_numbers<[1], [1], [0], [0], [0, 0, 1, 0], [], []>} : vector<8x32xf32>, vector<128x32xf32>, vector<8x128xf32> -> vector<8x128xf32>
    %11 = vector.extract_strided_slice %10 {offsets = [0, 0], sizes = [1, 128], strides = [1, 1]} : vector<8x128xf32> to vector<1x128xf32>
    %c0_10 = arith.constant 0 : index
    %c0_11 = arith.constant 0 : index
    %12 = vector.load %arg1[%c0_10, %c0_11] : memref<128x8xf32, #tpu.memory_space<vmem>>, vector<128x8xf32>
    %13 = arith.mulf %0, %12 : vector<128x8xf32>
    %cst_12 = arith.constant 1.000000e+00 : f32
    %14 = vector.broadcast %cst_12 : f32 to vector<8x8xf32>
    %cst_13 = arith.constant dense<0.000000e+00> : vector<8x128xf32>
    %15 = tpu.matmul %14, %13, %cst_13 {dimension_numbers = #tpu.dot_dimension_numbers<[1], [1], [0], [0], [0, 0, 1, 0], [], []>} : vector<8x8xf32>, vector<128x8xf32>, vector<8x128xf32> -> vector<8x128xf32>
    %16 = vector.extract_strided_slice %15 {offsets = [0, 0], sizes = [1, 128], strides = [1, 1]} : vector<8x128xf32> to vector<1x128xf32>
    %cst_14 = arith.constant 5.000000e-01 : f32
    %17 = vector.broadcast %cst_14 : f32 to vector<1x128xf32>
    %18 = arith.mulf %17, %11 : vector<1x128xf32>
    %19 = arith.addf %16, %18 : vector<1x128xf32>
    %c0_15 = arith.constant 0 : index
    %c0_16 = arith.constant 0 : index
    %20 = vector.load %arg8[%c0_15, %c0_16] : memref<1x128xf32, #tpu.memory_space<vmem>>, vector<1x128xf32>
    tpu.vector_store %arg8[%c0_15, %c0_16], %19 {strides = array<i32>} : memref<1x128xf32, #tpu.memory_space<vmem>>, vector<1x128xf32>,
    %c0_17 = arith.constant 0 : index
    %c0_18 = arith.constant 0 : index
    %21 = vector.load %arg6[%c0_17, %c0_18] : memref<32x32xf32, #tpu.memory_space<vmem>>, vector<32x32xf32>
    %cst_19 = arith.constant dense<0.000000e+00> : vector<32x128xf32>
    %22 = tpu.matmul %21, %4, %cst_19 {dimension_numbers = #tpu.dot_dimension_numbers<[1], [1], [0], [0], [0, 0, 1, 0], [], []>} : vector<32x32xf32>, vector<128x32xf32>, vector<32x128xf32> -> vector<32x128xf32>
    %c0_20 = arith.constant 0 : index
    %c0_21 = arith.constant 0 : index
    %23 = vector.load %arg7[%c0_20, %c0_21] : memref<32x1xf32, #tpu.memory_space<vmem>>, vector<32x1xf32>
    %24 = vector.broadcast %23 : vector<32x1xf32> to vector<32x128xf32>
    %25 = arith.addf %22, %24 : vector<32x128xf32>
    %c0_22 = arith.constant 0 : index
    %c0_23 = arith.constant 0 : index
    %26 = vector.load %arg9[%c0_22, %c0_23] : memref<32x128xf32, #tpu.memory_space<vmem>>, vector<32x128xf32>
    tpu.vector_store %arg9[%c0_22, %c0_23], %25 {strides = array<i32>} : memref<32x128xf32, #tpu.memory_space<vmem>>, vector<32x128xf32>,
    %27 = tpu.iota {dimensions = array<i32: 1>} : vector<1x128xi32>
    %c128_i32 = arith.constant 128 : i32
    %28 = arith.muli %arg0, %c128_i32 : i32
    %29 = vector.broadcast %28 : i32 to vector<1x128xi32>
    %30 = arith.addi %27, %29 : vector<1x128xi32>
    %c200_i32 = arith.constant 200 : i32
    %31 = vector.broadcast %c200_i32 : i32 to vector<1x128xi32>
    %32 = arith.cmpi slt, %30, %31 : vector<1x128xi32>
    %cst_24 = arith.constant 0.000000e+00 : f32
    %33 = vector.shape_cast %32 : vector<1x128xi1> to vector<1x128xi1>
    %34 = vector.broadcast %33 : vector<1x128xi1> to vector<32x128xi1>
    %35 = vector.broadcast %cst_24 : f32 to vector<32x128xf32>
    %36 = arith.select %34, %25, %35 : vector<32x128xi1>, vector<32x128xf32>
    %cst_25 = arith.constant dense<0.000000e+00> : vector<32xf32>
    %37 = vector.multi_reduction <add>, %36, %cst_25 [1] : vector<32x128xf32> to vector<32xf32>
    %38 = vector.shape_cast %37 : vector<32xf32> to vector<32x1xf32>
    %39 = arith.mulf %36, %36 : vector<32x128xf32>
    %cst_26 = arith.constant dense<0.000000e+00> : vector<32xf32>
    %40 = vector.multi_reduction <add>, %39, %cst_26 [1] : vector<32x128xf32> to vector<32xf32>
    %41 = vector.shape_cast %40 : vector<32xf32> to vector<32x1xf32>
    %42 = tpu.concatenate %38, %41 in 0 : vector<32x1xf32>, vector<32x1xf32> -> vector<64x1xf32>
    %c0_27 = arith.constant 0 : index
    %c0_28 = arith.constant 0 : index
    %c0_29 = arith.constant 0 : index
    %43 = vector.load %arg10[%c0_27, %c0_28, %c0_29] : memref<1x64x1xf32, #tpu.memory_space<vmem>>, vector<1x64x1xf32>
    %44 = vector.shape_cast %43 : vector<1x64x1xf32> to vector<64x1xf32>
    %45 = vector.shape_cast %42 : vector<64x1xf32> to vector<1x64x1xf32>
    tpu.vector_store %arg10[%c0_27, %c0_28, %c0_29], %45 {strides = array<i32>} : memref<1x64x1xf32, #tpu.memory_space<vmem>>, vector<1x64x1xf32>,
    return
  }
  func.func @transform_0(%arg0: i32) -> (i32, i32) {
    %c0_i32 = arith.constant 0 : i32
    %c0_i32_0 = arith.constant 0 : i32
    return %arg0, %c0_i32 : i32, i32
  }
  func.func @transform_1(%arg0: i32) -> (i32, i32) {
    %c0_i32 = arith.constant 0 : i32
    %c0_i32_0 = arith.constant 0 : i32
    return %arg0, %c0_i32 : i32, i32
  }
  func.func @transform_2(%arg0: i32) -> (i32, i32) {
    %c0_i32 = arith.constant 0 : i32
    %c0_i32_0 = arith.constant 0 : i32
    return %arg0, %c0_i32 : i32, i32
  }
  func.func @transform_3(%arg0: i32) -> (i32, i32) {
    %c0_i32 = arith.constant 0 : i32
    %c0_i32_0 = arith.constant 0 : i32
    %c0_i32_1 = arith.constant 0 : i32
    return %c0_i32, %c0_i32_0 : i32, i32
  }
  func.func @transform_4(%arg0: i32) -> (i32, i32) {
    %c0_i32 = arith.constant 0 : i32
    %c0_i32_0 = arith.constant 0 : i32
    %c0_i32_1 = arith.constant 0 : i32
    return %c0_i32, %c0_i32_0 : i32, i32
  }
  func.func @transform_5(%arg0: i32) -> (i32, i32) {
    %c0_i32 = arith.constant 0 : i32
    %c0_i32_0 = arith.constant 0 : i32
    %c0_i32_1 = arith.constant 0 : i32
    return %c0_i32, %c0_i32_0 : i32, i32
  }
  func.func @transform_6(%arg0: i32) -> (i32, i32) {
    %c0_i32 = arith.constant 0 : i32
    %c0_i32_0 = arith.constant 0 : i32
    %c0_i32_1 = arith.constant 0 : i32
    return %c0_i32, %c0_i32_0 : i32, i32
  }
  func.func @transform_7(%arg0: i32) -> (i32, i32) {
    %c0_i32 = arith.constant 0 : i32
    %c0_i32_0 = arith.constant 0 : i32
    return %c0_i32, %arg0 : i32, i32
  }
  func.func @transform_8(%arg0: i32) -> (i32, i32) {
    %c0_i32 = arith.constant 0 : i32
    %c0_i32_0 = arith.constant 0 : i32
    return %c0_i32, %arg0 : i32, i32
  }
  func.func @transform_9(%arg0: i32) -> (i32, i32, i32) {
    %c0_i32 = arith.constant 0 : i32
    %c0_i32_0 = arith.constant 0 : i32
    %c0_i32_1 = arith.constant 0 : i32
    return %arg0, %c0_i32, %c0_i32_0 : i32, i32, i32
  }
}

module attributes {stable_mosaic.version = 11 : i64} {
  func.func @_bn_linear_kernel(%arg0: i32, %arg1: memref<32x128xf32, #tpu.memory_space<vmem>>, %arg2: memref<32x1xf32, #tpu.memory_space<vmem>>, %arg3: memref<32x1xf32, #tpu.memory_space<vmem>>, %arg4: memref<32x32xf32, #tpu.memory_space<vmem>>, %arg5: memref<32x1xf32, #tpu.memory_space<vmem>>, %arg6: memref<32x128xf32, #tpu.memory_space<vmem>>, %arg7: memref<1x64x1xf32, #tpu.memory_space<vmem>>) attributes {dimension_semantics = [#tpu.dimension_semantics<parallel>], iteration_bounds = array<i64: 2>, scalar_prefetch = 0 : i64, scratch_operands = 0 : i64, tpu.core_type = #tpu.core_type<tc>, window_params = [{transform_indices = @transform_0, window_bounds = array<i64: 32, 128>}, {pipeline_mode = #tpu.pipeline_mode<synchronous>, transform_indices = @transform_1, window_bounds = array<i64: 32, 1>}, {pipeline_mode = #tpu.pipeline_mode<synchronous>, transform_indices = @transform_2, window_bounds = array<i64: 32, 1>}, {pipeline_mode = #tpu.pipeline_mode<synchronous>, transform_indices = @transform_3, window_bounds = array<i64: 32, 32>}, {pipeline_mode = #tpu.pipeline_mode<synchronous>, transform_indices = @transform_4, window_bounds = array<i64: 32, 1>}, {transform_indices = @transform_5, window_bounds = array<i64: 32, 128>}, {transform_indices = @transform_6, window_bounds = array<i64: 1, 64, 1>}]} {
    %c0 = arith.constant 0 : index
    %c0_0 = arith.constant 0 : index
    %0 = vector.load %arg1[%c0, %c0_0] : memref<32x128xf32, #tpu.memory_space<vmem>>, vector<32x128xf32>
    %c0_1 = arith.constant 0 : index
    %c0_2 = arith.constant 0 : index
    %1 = vector.load %arg2[%c0_1, %c0_2] : memref<32x1xf32, #tpu.memory_space<vmem>>, vector<32x1xf32>
    %2 = vector.broadcast %1 : vector<32x1xf32> to vector<32x128xf32>
    %3 = arith.mulf %0, %2 : vector<32x128xf32>
    %c0_3 = arith.constant 0 : index
    %c0_4 = arith.constant 0 : index
    %4 = vector.load %arg3[%c0_3, %c0_4] : memref<32x1xf32, #tpu.memory_space<vmem>>, vector<32x1xf32>
    %5 = vector.broadcast %4 : vector<32x1xf32> to vector<32x128xf32>
    %6 = arith.addf %3, %5 : vector<32x128xf32>
    %c0_5 = arith.constant 0 : index
    %c0_6 = arith.constant 0 : index
    %7 = vector.load %arg4[%c0_5, %c0_6] : memref<32x32xf32, #tpu.memory_space<vmem>>, vector<32x32xf32>
    %cst = arith.constant dense<0.000000e+00> : vector<32x128xf32>
    %8 = tpu.matmul %7, %6, %cst {dimension_numbers = #tpu.dot_dimension_numbers<[1], [0], [0], [1], [0, 0, 1, 1], [], []>} : vector<32x32xf32>, vector<32x128xf32>, vector<32x128xf32> -> vector<32x128xf32>
    %c0_7 = arith.constant 0 : index
    %c0_8 = arith.constant 0 : index
    %9 = vector.load %arg5[%c0_7, %c0_8] : memref<32x1xf32, #tpu.memory_space<vmem>>, vector<32x1xf32>
    %10 = vector.broadcast %9 : vector<32x1xf32> to vector<32x128xf32>
    %11 = arith.addf %8, %10 : vector<32x128xf32>
    %c0_9 = arith.constant 0 : index
    %c0_10 = arith.constant 0 : index
    %12 = vector.load %arg6[%c0_9, %c0_10] : memref<32x128xf32, #tpu.memory_space<vmem>>, vector<32x128xf32>
    tpu.vector_store %arg6[%c0_9, %c0_10], %11 {strides = array<i32>} : memref<32x128xf32, #tpu.memory_space<vmem>>, vector<32x128xf32>,
    %13 = tpu.iota {dimensions = array<i32: 1>} : vector<1x128xi32>
    %c128_i32 = arith.constant 128 : i32
    %14 = arith.muli %arg0, %c128_i32 : i32
    %15 = vector.broadcast %14 : i32 to vector<1x128xi32>
    %16 = arith.addi %13, %15 : vector<1x128xi32>
    %c200_i32 = arith.constant 200 : i32
    %17 = vector.broadcast %c200_i32 : i32 to vector<1x128xi32>
    %18 = arith.cmpi slt, %16, %17 : vector<1x128xi32>
    %cst_11 = arith.constant 0.000000e+00 : f32
    %19 = vector.shape_cast %18 : vector<1x128xi1> to vector<1x128xi1>
    %20 = vector.broadcast %19 : vector<1x128xi1> to vector<32x128xi1>
    %21 = vector.broadcast %cst_11 : f32 to vector<32x128xf32>
    %22 = arith.select %20, %11, %21 : vector<32x128xi1>, vector<32x128xf32>
    %cst_12 = arith.constant dense<0.000000e+00> : vector<32xf32>
    %23 = vector.multi_reduction <add>, %22, %cst_12 [1] : vector<32x128xf32> to vector<32xf32>
    %24 = vector.shape_cast %23 : vector<32xf32> to vector<32x1xf32>
    %25 = arith.mulf %22, %22 : vector<32x128xf32>
    %cst_13 = arith.constant dense<0.000000e+00> : vector<32xf32>
    %26 = vector.multi_reduction <add>, %25, %cst_13 [1] : vector<32x128xf32> to vector<32xf32>
    %27 = vector.shape_cast %26 : vector<32xf32> to vector<32x1xf32>
    %28 = tpu.concatenate %24, %27 in 0 : vector<32x1xf32>, vector<32x1xf32> -> vector<64x1xf32>
    %c0_14 = arith.constant 0 : index
    %c0_15 = arith.constant 0 : index
    %c0_16 = arith.constant 0 : index
    %29 = vector.load %arg7[%c0_14, %c0_15, %c0_16] : memref<1x64x1xf32, #tpu.memory_space<vmem>>, vector<1x64x1xf32>
    %30 = vector.shape_cast %29 : vector<1x64x1xf32> to vector<64x1xf32>
    %31 = vector.shape_cast %28 : vector<64x1xf32> to vector<1x64x1xf32>
    tpu.vector_store %arg7[%c0_14, %c0_15, %c0_16], %31 {strides = array<i32>} : memref<1x64x1xf32, #tpu.memory_space<vmem>>, vector<1x64x1xf32>,
    return
  }
  func.func @transform_0(%arg0: i32) -> (i32, i32) {
    %c0_i32 = arith.constant 0 : i32
    %c0_i32_0 = arith.constant 0 : i32
    return %c0_i32, %arg0 : i32, i32
  }
  func.func @transform_1(%arg0: i32) -> (i32, i32) {
    %c0_i32 = arith.constant 0 : i32
    %c0_i32_0 = arith.constant 0 : i32
    %c0_i32_1 = arith.constant 0 : i32
    return %c0_i32, %c0_i32_0 : i32, i32
  }
  func.func @transform_2(%arg0: i32) -> (i32, i32) {
    %c0_i32 = arith.constant 0 : i32
    %c0_i32_0 = arith.constant 0 : i32
    %c0_i32_1 = arith.constant 0 : i32
    return %c0_i32, %c0_i32_0 : i32, i32
  }
  func.func @transform_3(%arg0: i32) -> (i32, i32) {
    %c0_i32 = arith.constant 0 : i32
    %c0_i32_0 = arith.constant 0 : i32
    %c0_i32_1 = arith.constant 0 : i32
    return %c0_i32, %c0_i32_0 : i32, i32
  }
  func.func @transform_4(%arg0: i32) -> (i32, i32) {
    %c0_i32 = arith.constant 0 : i32
    %c0_i32_0 = arith.constant 0 : i32
    %c0_i32_1 = arith.constant 0 : i32
    return %c0_i32, %c0_i32_0 : i32, i32
  }
  func.func @transform_5(%arg0: i32) -> (i32, i32) {
    %c0_i32 = arith.constant 0 : i32
    %c0_i32_0 = arith.constant 0 : i32
    return %c0_i32, %arg0 : i32, i32
  }
  func.func @transform_6(%arg0: i32) -> (i32, i32, i32) {
    %c0_i32 = arith.constant 0 : i32
    %c0_i32_0 = arith.constant 0 : i32
    %c0_i32_1 = arith.constant 0 : i32
    return %arg0, %c0_i32, %c0_i32_0 : i32, i32, i32
  }
}

module attributes {stable_mosaic.version = 11 : i64} {
  func.func @_bn_reduce_kernel(%arg0: i32, %arg1: memref<32x128xf32, #tpu.memory_space<vmem>>, %arg2: memref<1x32xf32, #tpu.memory_space<vmem>>, %arg3: memref<1x128xf32, #tpu.memory_space<vmem>>, %arg4: memref<1x128xf32, #tpu.memory_space<vmem>>, %arg5: memref<1x128xf32, #tpu.memory_space<vmem>>) attributes {dimension_semantics = [#tpu.dimension_semantics<parallel>], iteration_bounds = array<i64: 2>, scalar_prefetch = 0 : i64, scratch_operands = 0 : i64, tpu.core_type = #tpu.core_type<tc>, window_params = [{transform_indices = @transform_0, window_bounds = array<i64: 32, 128>}, {pipeline_mode = #tpu.pipeline_mode<synchronous>, transform_indices = @transform_1, window_bounds = array<i64: 1, 32>}, {transform_indices = @transform_2, window_bounds = array<i64: 1, 128>}, {transform_indices = @transform_3, window_bounds = array<i64: 1, 128>}, {transform_indices = @transform_4, window_bounds = array<i64: 1, 128>}]} {
    %c0 = arith.constant 0 : index
    %c0_0 = arith.constant 0 : index
    %0 = vector.load %arg2[%c0, %c0_0] : memref<1x32xf32, #tpu.memory_space<vmem>>, vector<1x32xf32>
    %1 = vector.shape_cast %0 : vector<1x32xf32> to vector<1x32xf32>
    %2 = vector.broadcast %1 : vector<1x32xf32> to vector<8x32xf32>
    %c0_1 = arith.constant 0 : index
    %c0_2 = arith.constant 0 : index
    %3 = vector.load %arg1[%c0_1, %c0_2] : memref<32x128xf32, #tpu.memory_space<vmem>>, vector<32x128xf32>
    %cst = arith.constant dense<0.000000e+00> : vector<8x128xf32>
    %4 = tpu.matmul %2, %3, %cst {dimension_numbers = #tpu.dot_dimension_numbers<[1], [0], [0], [1], [0, 0, 1, 1], [], []>} : vector<8x32xf32>, vector<32x128xf32>, vector<8x128xf32> -> vector<8x128xf32>
    %5 = vector.extract_strided_slice %4 {offsets = [0, 0], sizes = [1, 128], strides = [1, 1]} : vector<8x128xf32> to vector<1x128xf32>
    %c0_3 = arith.constant 0 : index
    %c0_4 = arith.constant 0 : index
    %6 = vector.load %arg3[%c0_3, %c0_4] : memref<1x128xf32, #tpu.memory_space<vmem>>, vector<1x128xf32>
    %7 = arith.addf %5, %6 : vector<1x128xf32>
    %c0_5 = arith.constant 0 : index
    %c0_6 = arith.constant 0 : index
    %8 = vector.load %arg4[%c0_5, %c0_6] : memref<1x128xf32, #tpu.memory_space<vmem>>, vector<1x128xf32>
    %9 = arith.addf %7, %8 : vector<1x128xf32>
    %c0_7 = arith.constant 0 : index
    %c0_8 = arith.constant 0 : index
    %10 = vector.load %arg5[%c0_7, %c0_8] : memref<1x128xf32, #tpu.memory_space<vmem>>, vector<1x128xf32>
    tpu.vector_store %arg5[%c0_7, %c0_8], %9 {strides = array<i32>} : memref<1x128xf32, #tpu.memory_space<vmem>>, vector<1x128xf32>,
    return
  }
  func.func @transform_0(%arg0: i32) -> (i32, i32) {
    %c0_i32 = arith.constant 0 : i32
    %c0_i32_0 = arith.constant 0 : i32
    return %c0_i32, %arg0 : i32, i32
  }
  func.func @transform_1(%arg0: i32) -> (i32, i32) {
    %c0_i32 = arith.constant 0 : i32
    %c0_i32_0 = arith.constant 0 : i32
    %c0_i32_1 = arith.constant 0 : i32
    return %c0_i32, %c0_i32_0 : i32, i32
  }
  func.func @transform_2(%arg0: i32) -> (i32, i32) {
    %c0_i32 = arith.constant 0 : i32
    %c0_i32_0 = arith.constant 0 : i32
    return %c0_i32, %arg0 : i32, i32
  }
  func.func @transform_3(%arg0: i32) -> (i32, i32) {
    %c0_i32 = arith.constant 0 : i32
    %c0_i32_0 = arith.constant 0 : i32
    return %c0_i32, %arg0 : i32, i32
  }
  func.func @transform_4(%arg0: i32) -> (i32, i32) {
    %c0_i32 = arith.constant 0 : i32
    %c0_i32_0 = arith.constant 0 : i32
    return %c0_i32, %arg0 : i32, i32
  }
}

</mosaic_0001>

<bundles_post_ra>
// kernel: tile.8
= control target key start
LH: loop header
LB: loop body
LE: loop exit
PB: predicated region body
PF: predicated region fallthrough
CT: control target
= control target key end

     0   :  { %s226_s0 = inlined_call_operand.vmem [shape: f32[4,4], index: 0, kind: input, shape index: {}]   ;;  %s227_s1 = inlined_call_operand.vmem [shape: f32[8,4,8,4], index: 1, kind: output, shape index: {}]  }
   0x1   :  { %v4_v0 = vld [vmem:[%s226_s0] ss:$0 sm:$0xff]  ;;  %v81_v1 = vld [vmem:[%s226_s0 + $0x1] ss:$0 sm:$0xff]  ;;  %v90_v2 = vld [vmem:[%s226_s0 + $0x2] ss:$0 sm:$0xff] }
   0x2   :  { %5 = vst [vmem:[%s227_s1] sm:$0xff] %v4_v0  ;;  %v99_v3 = vld [vmem:[%s226_s0 + $0x3] ss:$0 sm:$0xff] }
   0x3   :  { %74 = vst [vmem:[%s227_s1 + $0x20] sm:$0xff] %v4_v0 }
   0x4   :  { %75 = vst [vmem:[%s227_s1 + $0x40] sm:$0xff] %v4_v0 }
   0x5   :  { %76 = vst [vmem:[%s227_s1 + $0x60] sm:$0xff] %v4_v0 }
   0x6   :  { %77 = vst [vmem:[%s227_s1 + $0x80] sm:$0xff] %v4_v0 }
   0x7   :  { %78 = vst [vmem:[%s227_s1 + $0xa0] sm:$0xff] %v4_v0 }
   0x8   :  { %79 = vst [vmem:[%s227_s1 + $0xc0] sm:$0xff] %v4_v0 }
   0x9   :  { %80 = vst [vmem:[%s227_s1 + $0xe0] sm:$0xff] %v4_v0 }
   0xa   :  { %82 = vst [vmem:[%s227_s1 + $0x8] sm:$0xff] %v81_v1 }
   0xb   :  { %83 = vst [vmem:[%s227_s1 + $0x28] sm:$0xff] %v81_v1 }
   0xc   :  { %84 = vst [vmem:[%s227_s1 + $0x48] sm:$0xff] %v81_v1 }
   0xd   :  { %85 = vst [vmem:[%s227_s1 + $0x68] sm:$0xff] %v81_v1 }
   0xe   :  { %86 = vst [vmem:[%s227_s1 + $0x88] sm:$0xff] %v81_v1 }
   0xf   :  { %87 = vst [vmem:[%s227_s1 + $0xa8] sm:$0xff] %v81_v1 }
  0x10   :  { %88 = vst [vmem:[%s227_s1 + $0xc8] sm:$0xff] %v81_v1 }
  0x11   :  { %89 = vst [vmem:[%s227_s1 + $0xe8] sm:$0xff] %v81_v1 }
  0x12   :  { %91 = vst [vmem:[%s227_s1 + $0x10] sm:$0xff] %v90_v2 }
  0x13   :  { %92 = vst [vmem:[%s227_s1 + $0x30] sm:$0xff] %v90_v2 }
  0x14   :  { %93 = vst [vmem:[%s227_s1 + $0x50] sm:$0xff] %v90_v2 }
  0x15   :  { %94 = vst [vmem:[%s227_s1 + $0x70] sm:$0xff] %v90_v2 }
  0x16   :  { %95 = vst [vmem:[%s227_s1 + $0x90] sm:$0xff] %v90_v2 }
  0x17   :  { %96 = vst [vmem:[%s227_s1 + $0xb0] sm:$0xff] %v90_v2 }
  0x18   :  { %97 = vst [vmem:[%s227_s1 + $0xd0] sm:$0xff] %v90_v2 }
  0x19   :  { %98 = vst [vmem:[%s227_s1 + $0xf0] sm:$0xff] %v90_v2 }
  0x1a   :  { %100 = vst [vmem:[%s227_s1 + $0x18] sm:$0xff] %v99_v3 }
  0x1b   :  { %101 = vst [vmem:[%s227_s1 + $0x38] sm:$0xff] %v99_v3 }
  0x1c   :  { %102 = vst [vmem:[%s227_s1 + $0x58] sm:$0xff] %v99_v3 }
  0x1d   :  { %103 = vst [vmem:[%s227_s1 + $0x78] sm:$0xff] %v99_v3 }
  0x1e   :  { %104 = vst [vmem:[%s227_s1 + $0x98] sm:$0xff] %v99_v3 }
  0x1f   :  { %105 = vst [vmem:[%s227_s1 + $0xb8] sm:$0xff] %v99_v3 }
  0x20   :  { %106 = vst [vmem:[%s227_s1 + $0xd8] sm:$0xff] %v99_v3 }
  0x21   :  { %107 = vst [vmem:[%s227_s1 + $0xf8] sm:$0xff] %v99_v3 }

// kernel: tile.9
= control target key start
LH: loop header
LB: loop body
LE: loop exit
PB: predicated region body
PF: predicated region fallthrough
CT: control target
= control target key end

     0   :  { %vm4_vm0 = vcmask 1047556   ;;  %s429_s14 = smov 28   ;;  %s430_s27 = smov 24   ;;  %vm6_vm1 = vcmask 31744   ;;  %vm43_vm2 = vcmask 261344   ;;  %vm86_vm3 = vcmask 228544   ;;  %s782_s0 = inlined_call_operand.vmem [shape: f32[8,4,8,4], index: 0, kind: input, shape index: {}]   ;;  %s783_s1 = inlined_call_operand.vmem [shape: f32[32,32], index: 1, kind: output, shape index: {}]  }
   0x1   :  { %v345_v0 = vld [vmem:[%s782_s0 + $0x7] ss:$8 sm:$0xf]   ;;  %v356_v11 = vld [vmem:[%s782_s0 + $0x6] ss:$8 sm:$0xf]  }
   0x2   :  { %v346_v1 = vld [vmem:[%s782_s0 + $0x7] ss:$8 sm:$0xf0]   ;;  %v357_v13 = vld [vmem:[%s782_s0 + $0x6] ss:$8 sm:$0xf0]  }
   0x3   :  { %v40_v2 = vsel %vm4_vm0, %v346_v1, %v345_v0  ;;  %v350_v3 = vld [vmem:[%s782_s0 + $0x87] ss:$8 sm:$0xf]   ;;  %v83_v14 = vsel %vm4_vm0, %v357_v13, %v356_v11  ;;  %v361_v15 = vld [vmem:[%s782_s0 + $0x86] ss:$8 sm:$0xf]  }
   0x4   :  { %v351_v4 = vld [vmem:[%s782_s0 + $0x87] ss:$8 sm:$0xf0]   ;;  %41 = vrot.lane.b32.xlu0 %v40_v2, %s429_s14  ;;  %84 = vrot.lane.b32.xlu2 %v83_v14, %s430_s27  ;;  %v362_v16 = vld [vmem:[%s782_s0 + $0x86] ss:$8 sm:$0xf0]  }
   0x5   :  { %v61_v5 = vsel %vm4_vm0, %v351_v4, %v350_v3  ;;  %v347_v6 = vld [vmem:[%s782_s0 + $0x47] ss:$8 sm:$0xf]   ;;  %v358_v17 = vld [vmem:[%s782_s0 + $0x46] ss:$8 sm:$0xf]   ;;  %v104_v21 = vsel %vm4_vm0, %v362_v16, %v361_v15 }
   0x6   :  { %62 = vrot.lane.b32.xlu1 %v61_v5, %s429_s14  ;;  %v348_v7 = vld [vmem:[%s782_s0 + $0x47] ss:$8 sm:$0xf0]   ;;  %v359_v18 = vld [vmem:[%s782_s0 + $0x46] ss:$8 sm:$0xf0]  }
   0x7   :  { %v353_v8 = vld [vmem:[%s782_s0 + $0xc7] ss:$8 sm:$0xf]   ;;  %v50_v10 = vsel %vm4_vm0, %v348_v7, %v347_v6  ;;  %v364_v19 = vld [vmem:[%s782_s0 + $0xc6] ss:$8 sm:$0xf]   ;;  %v93_v22 = vsel %vm4_vm0, %v359_v18, %v358_v17 }
   0x8   :  { %v354_v9 = vld [vmem:[%s782_s0 + $0xc7] ss:$8 sm:$0xf0]   ;;  %v365_v20 = vld [vmem:[%s782_s0 + $0xc6] ss:$8 sm:$0xf0]  }
   0x9   :  { %v72_v12 = vsel %vm4_vm0, %v354_v9, %v353_v8  ;;  %v115_v23 = vsel %vm4_vm0, %v365_v20, %v364_v19  ;;  %v369_v24 = vld [vmem:[%s782_s0 + $0x45] ss:$8 sm:$0xf]   ;;  %s431_s23 = smov 20   ;;  %s432_s7 = smov 16   ;;  %vm129_vm4 = vcmask 195744  }
   0xa   :  { %v370_v25 = vld [vmem:[%s782_s0 + $0x45] ss:$8 sm:$0xf0]   ;;  %v378_v33 = vld [vmem:[%s782_s0 + $0x4] ss:$8 sm:$0xf]  }
   0xb   :  { %v367_v26 = vld [vmem:[%s782_s0 + $0x5] ss:$8 sm:$0xf]   ;;  %v136_v30 = vsel %vm4_vm0, %v370_v25, %v369_v24  ;;  %v379_v34 = vld [vmem:[%s782_s0 + $0x4] ss:$8 sm:$0xf0]  }
   0xc   :  { %51 = vrot.lane.b32.xlu0 %v50_v10, %s429_s14  ;;  %94 = vrot.lane.b32.xlu2 %v93_v22, %s430_s27  ;;  %v368_v27 = vld [vmem:[%s782_s0 + $0x5] ss:$8 sm:$0xf0]   ;;  %v380_v37 = vld [vmem:[%s782_s0 + $0x44] ss:$8 sm:$0xf]   ;;  %v169_v39 = vsel %vm4_vm0, %v379_v34, %v378_v33 }
   0xd   :  { %v372_v28 = vld [vmem:[%s782_s0 + $0x85] ss:$8 sm:$0xf]   ;;  %v126_v31 = vsel %vm4_vm0, %v368_v27, %v367_v26  ;;  %v381_v38 = vld [vmem:[%s782_s0 + $0x44] ss:$8 sm:$0xf0]  }
   0xe   :  { %73 = vrot.lane.b32.xlu1 %v72_v12, %s429_s14  ;;  %v373_v29 = vld [vmem:[%s782_s0 + $0x85] ss:$8 sm:$0xf0]   ;;  %v179_v41 = vsel %vm4_vm0, %v381_v38, %v380_v37  ;;  %v386_v42 = vld [vmem:[%s782_s0 + $0xc4] ss:$8 sm:$0xf]  }
   0xf   :  { %v147_v32 = vsel %vm4_vm0, %v373_v29, %v372_v28  ;;  %v375_v35 = vld [vmem:[%s782_s0 + $0xc5] ss:$8 sm:$0xf]   ;;  %v387_v43 = vld [vmem:[%s782_s0 + $0xc4] ss:$8 sm:$0xf0]  }
  0x10   :  { %v376_v36 = vld [vmem:[%s782_s0 + $0xc5] ss:$8 sm:$0xf0]   ;;  %v383_v44 = vld [vmem:[%s782_s0 + $0x84] ss:$8 sm:$0xf]   ;;  %v201_v48 = vsel %vm4_vm0, %v387_v43, %v386_v42 }
  0x11   :  { %v158_v40 = vsel %vm4_vm0, %v376_v36, %v375_v35  ;;  %v384_v45 = vld [vmem:[%s782_s0 + $0x84] ss:$8 sm:$0xf0]   ;;  %v389_v46 = vld [vmem:[%s782_s0 + $0x3] ss:$8 sm:$0xf]  }
  0x12   :  { %v390_v47 = vld [vmem:[%s782_s0 + $0x3] ss:$8 sm:$0xf0]   ;;  %v190_v49 = vsel %vm4_vm0, %v384_v45, %v383_v44  ;;  %s433_s20 = smov 12   ;;  %s434_s16 = smov 8   ;;  %vm172_vm5 = vcmask 162944  }
  0x13   :  { %v212_v50 = vsel %vm4_vm0, %v390_v47, %v389_v46  ;;  %v394_v51 = vld [vmem:[%s782_s0 + $0x83] ss:$8 sm:$0xf]   ;;  %v402_v60 = vld [vmem:[%s782_s0 + $0x42] ss:$8 sm:$0xf]  }
  0x14   :  { %105 = vrot.lane.b32.xlu0 %v104_v21, %s430_s27  ;;  %127 = vrot.lane.b32.xlu2 %v126_v31, %s431_s23  ;;  %v395_v52 = vld [vmem:[%s782_s0 + $0x83] ss:$8 sm:$0xf0]   ;;  %v403_v61 = vld [vmem:[%s782_s0 + $0x42] ss:$8 sm:$0xf0]  }
  0x15   :  { %v391_v53 = vld [vmem:[%s782_s0 + $0x43] ss:$8 sm:$0xf]   ;;  %v233_v57 = vsel %vm4_vm0, %v395_v52, %v394_v51  ;;  %v400_v62 = vld [vmem:[%s782_s0 + $0x2] ss:$8 sm:$0xf]   ;;  %v265_v2 = vsel %vm4_vm0, %v403_v61, %v402_v60 }
  0x16   :  { %116 = vrot.lane.b32.xlu1 %v115_v23, %s430_s27  ;;  %v392_v54 = vld [vmem:[%s782_s0 + $0x43] ss:$8 sm:$0xf0]   ;;  %v401_v63 = vld [vmem:[%s782_s0 + $0x2] ss:$8 sm:$0xf0]  }
  0x17   :  { %v397_v55 = vld [vmem:[%s782_s0 + $0xc3] ss:$8 sm:$0xf]   ;;  %v222_v58 = vsel %vm4_vm0, %v392_v54, %v391_v53  ;;  %v405_v0 = vld [vmem:[%s782_s0 + $0x82] ss:$8 sm:$0xf]   ;;  %v255_v3 = vsel %vm4_vm0, %v401_v63, %v400_v62 }
  0x18   :  { %v398_v56 = vld [vmem:[%s782_s0 + $0xc3] ss:$8 sm:$0xf0]   ;;  %v406_v1 = vld [vmem:[%s782_s0 + $0x82] ss:$8 sm:$0xf0]  }
  0x19   :  { %v244_v59 = vsel %vm4_vm0, %v398_v56, %v397_v55  ;;  %v276_v4 = vsel %vm4_vm0, %v406_v1, %v405_v0  ;;  %v411_v5 = vld [vmem:[%s782_s0 + $0x1] ss:$8 sm:$0xf]   ;;  %v408_v7 = vld [vmem:[%s782_s0 + $0xc2] ss:$8 sm:$0xf]  }
  0x1a   :  { %v412_v6 = vld [vmem:[%s782_s0 + $0x1] ss:$8 sm:$0xf0]   ;;  %v409_v8 = vld [vmem:[%s782_s0 + $0xc2] ss:$8 sm:$0xf0]  }
  0x1b   :  { %v413_v9 = vld [vmem:[%s782_s0 + $0x41] ss:$8 sm:$0xf]   ;;  %v298_v11 = vsel %vm4_vm0, %v412_v6, %v411_v5  ;;  %v287_v12 = vsel %vm4_vm0, %v409_v8, %v408_v7  ;;  %s435_s29 = smov 4   ;;  %vm215_vm6 = vcmask 130144   ;;  %vm258_vm7 = vcmask 97344  }
  0x1c   :  { %137 = vrot.lane.b32.xlu0 %v136_v30, %s431_s23  ;;  %159 = vrot.lane.b32.xlu2 %v158_v40, %s431_s23  ;;  %v414_v10 = vld [vmem:[%s782_s0 + $0x41] ss:$8 sm:$0xf0]   ;;  %v2_v20 = vld [vmem:[%s782_s0] ss:$8 sm:$0xf]  }
  0x1d   :  { %v308_v13 = vsel %vm4_vm0, %v414_v10, %v413_v9  ;;  %v419_v14 = vld [vmem:[%s782_s0 + $0xc1] ss:$8 sm:$0xf]   ;;  %v3_v21 = vld [vmem:[%s782_s0] ss:$8 sm:$0xf0]  }
  0x1e   :  { %148 = vrot.lane.b32.xlu1 %v147_v32, %s431_s23  ;;  %v420_v15 = vld [vmem:[%s782_s0 + $0xc1] ss:$8 sm:$0xf0]   ;;  %v5_v22 = vsel %vm4_vm0, %v3_v21, %v2_v20  ;;  %v339_v23 = vld [vmem:[%s782_s0 + $0x80] ss:$8 sm:$0xf]  }
  0x1f   :  { %v416_v16 = vld [vmem:[%s782_s0 + $0x81] ss:$8 sm:$0xf]   ;;  %v330_v18 = vsel %vm4_vm0, %v420_v15, %v419_v14  ;;  %7 = vst.msk [vmem:[%s783_s1] sm:$0xff] %vm6_vm1, %v5_v22   ;;  %vm301_vm8 = vcmask 64544  }
  0x20   :  { %v417_v17 = vld [vmem:[%s782_s0 + $0x81] ss:$8 sm:$0xf0]   ;;  %v340_v24 = vld [vmem:[%s782_s0 + $0x80] ss:$8 sm:$0xf0]  }
  0x21   :  { %v319_v19 = vsel %vm4_vm0, %v417_v17, %v416_v16  ;;  %v22_v25 = vsel %vm4_vm0, %v340_v24, %v339_v23  ;;  %v336_v26 = vld [vmem:[%s782_s0 + $0x40] ss:$8 sm:$0xf]  }
  0x22   :  { %341 = vst.msk [vmem:[%s783_s1 + $0x10] sm:$0xff] %vm6_vm1, %v22_v25   ;;  %v337_v27 = vld [vmem:[%s782_s0 + $0x40] ss:$8 sm:$0xf0]  }
  0x23   :  { %v13_v28 = vsel %vm4_vm0, %v337_v27, %v336_v26  ;;  %v342_v29 = vld [vmem:[%s782_s0 + $0xc0] ss:$8 sm:$0xf]  }
  0x24   :  { %170 = vrot.lane.b32.xlu0 %v169_v39, %s432_s7  ;;  %191 = vrot.lane.b32.xlu2 %v190_v49, %s432_s7  ;;  %338 = vst.msk [vmem:[%s783_s1 + $0x8] sm:$0xff] %vm6_vm1, %v13_v28   ;;  %v343_v30 = vld [vmem:[%s782_s0 + $0xc0] ss:$8 sm:$0xf0]  }
  0x25   :  { %v31_v31 = vsel %vm4_vm0, %v343_v30, %v342_v29 }
  0x26   :  { %180 = vrot.lane.b32.xlu1 %v179_v41, %s432_s7  ;;  %344 = vst.msk [vmem:[%s783_s1 + $0x18] sm:$0xff] %vm6_vm1, %v31_v31  }
  0x2c   :  { %202 = vrot.lane.b32.xlu0 %v201_v48, %s432_s7  ;;  %223 = vrot.lane.b32.xlu2 %v222_v58, %s433_s20 }
  0x2e   :  { %213 = vrot.lane.b32.xlu1 %v212_v50, %s433_s20 }
  0x34   :  { %234 = vrot.lane.b32.xlu0 %v233_v57, %s433_s20  ;;  %256 = vrot.lane.b32.xlu2 %v255_v3, %s434_s16 }
  0x36   :  { %245 = vrot.lane.b32.xlu1 %v244_v59, %s433_s20 }
  0x3c   :  { %266 = vrot.lane.b32.xlu0 %v265_v2, %s434_s16  ;;  %288 = vrot.lane.b32.xlu2 %v287_v12, %s434_s16 }
  0x3e   :  { %277 = vrot.lane.b32.xlu1 %v276_v4, %s434_s16 }
  0x44   :  { %299 = vrot.lane.b32.xlu0 %v298_v11, %s435_s29  ;;  %320 = vrot.lane.b32.xlu2 %v319_v19, %s435_s29 }
  0x46   :  { %309 = vrot.lane.b32.xlu1 %v308_v13, %s435_s29 }
  0x4c   :  { %331 = vrot.lane.b32.xlu0 %v330_v18, %s435_s29 }
  0x5e   :  { %v85_v32 = vpop.permute.xlu2 %84  }
  0x66   :  { %v95_v33 = vpop.permute.xlu2 %94  }
  0x6e   :  { %v128_v35 = vpop.permute.xlu2 %127  }
  0x76   :  { %v42_v34 = vpop.permute.xlu0 %41   ;;  %v160_v38 = vpop.permute.xlu2 %159  }
  0x77   :  { %44 = vst.msk [vmem:[%s783_s1] sm:$0xff] %vm43_vm2, %v42_v34  }
  0x78   :  { %v63_v36 = vpop.permute.xlu1 %62   ;;  %87 = vst.msk [vmem:[%s783_s1] sm:$0xff] %vm86_vm3, %v85_v32  }
  0x79   :  { %352 = vst.msk [vmem:[%s783_s1 + $0x10] sm:$0xff] %vm43_vm2, %v63_v36  }
  0x7a   :  { %130 = vst.msk [vmem:[%s783_s1] sm:$0xff] %vm129_vm4, %v128_v35  }
  0x7e   :  { %v52_v37 = vpop.permute.xlu0 %51   ;;  %v192_v41 = vpop.permute.xlu2 %191  }
  0x7f   :  { %349 = vst.msk [vmem:[%s783_s1 + $0x8] sm:$0xff] %vm43_vm2, %v52_v37  }
  0x80   :  { %v74_v39 = vpop.permute.xlu1 %73   ;;  %360 = vst.msk [vmem:[%s783_s1 + $0x8] sm:$0xff] %vm86_vm3, %v95_v33  }
  0x81   :  { %355 = vst.msk [vmem:[%s783_s1 + $0x18] sm:$0xff] %vm43_vm2, %v74_v39  }
  0x86   :  { %v106_v40 = vpop.permute.xlu0 %105   ;;  %v224_v44 = vpop.permute.xlu2 %223  }
  0x87   :  { %363 = vst.msk [vmem:[%s783_s1 + $0x10] sm:$0xff] %vm86_vm3, %v106_v40  }
  0x88   :  { %v117_v42 = vpop.permute.xlu1 %116  }
  0x89   :  { %366 = vst.msk [vmem:[%s783_s1 + $0x18] sm:$0xff] %vm86_vm3, %v117_v42  }
  0x8a   :  { %377 = vst.msk [vmem:[%s783_s1 + $0x18] sm:$0xff] %vm129_vm4, %v160_v38  }
  0x8e   :  { %v138_v43 = vpop.permute.xlu0 %137   ;;  %v257_v47 = vpop.permute.xlu2 %256  }
  0x8f   :  { %371 = vst.msk [vmem:[%s783_s1 + $0x8] sm:$0xff] %vm129_vm4, %v138_v43  }
  0x90   :  { %v149_v45 = vpop.permute.xlu1 %148  }
  0x91   :  { %374 = vst.msk [vmem:[%s783_s1 + $0x10] sm:$0xff] %vm129_vm4, %v149_v45  }
  0x92   :  { %385 = vst.msk [vmem:[%s783_s1 + $0x10] sm:$0xff] %vm172_vm5, %v192_v41  }
  0x96   :  { %v171_v46 = vpop.permute.xlu0 %170   ;;  %v289_v50 = vpop.permute.xlu2 %288  }
  0x97   :  { %173 = vst.msk [vmem:[%s783_s1] sm:$0xff] %vm172_vm5, %v171_v46  }
  0x98   :  { %v181_v48 = vpop.permute.xlu1 %180  }
  0x99   :  { %382 = vst.msk [vmem:[%s783_s1 + $0x8] sm:$0xff] %vm172_vm5, %v181_v48  }
  0x9a   :  { %393 = vst.msk [vmem:[%s783_s1 + $0x8] sm:$0xff] %vm215_vm6, %v224_v44  }
  0x9e   :  { %v203_v49 = vpop.permute.xlu0 %202   ;;  %v321_v53 = vpop.permute.xlu2 %320  }
  0x9f   :  { %388 = vst.msk [vmem:[%s783_s1 + $0x18] sm:$0xff] %vm172_vm5, %v203_v49  }
  0xa0   :  { %v214_v51 = vpop.permute.xlu1 %213  }
  0xa1   :  { %216 = vst.msk [vmem:[%s783_s1] sm:$0xff] %vm215_vm6, %v214_v51  }
  0xa2   :  { %259 = vst.msk [vmem:[%s783_s1] sm:$0xff] %vm258_vm7, %v257_v47  }
  0xa6   :  { %v235_v52 = vpop.permute.xlu0 %234  }
  0xa7   :  { %396 = vst.msk [vmem:[%s783_s1 + $0x10] sm:$0xff] %vm215_vm6, %v235_v52  }
  0xa8   :  { %v246_v54 = vpop.permute.xlu1 %245  }
  0xa9   :  { %399 = vst.msk [vmem:[%s783_s1 + $0x18] sm:$0xff] %vm215_vm6, %v246_v54  }
  0xaa   :  { %410 = vst.msk [vmem:[%s783_s1 + $0x18] sm:$0xff] %vm258_vm7, %v289_v50  }
  0xae   :  { %v267_v55 = vpop.permute.xlu0 %266  }
  0xaf   :  { %404 = vst.msk [vmem:[%s783_s1 + $0x8] sm:$0xff] %vm258_vm7, %v267_v55  }
  0xb0   :  { %v278_v56 = vpop.permute.xlu1 %277  }
  0xb1   :  { %407 = vst.msk [vmem:[%s783_s1 + $0x10] sm:$0xff] %vm258_vm7, %v278_v56  }
  0xb2   :  { %418 = vst.msk [vmem:[%s783_s1 + $0x10] sm:$0xff] %vm301_vm8, %v321_v53  }
  0xb6   :  { %v300_v57 = vpop.permute.xlu0 %299  }
  0xb7   :  { %302 = vst.msk [vmem:[%s783_s1] sm:$0xff] %vm301_vm8, %v300_v57  }
  0xb8   :  { %v310_v58 = vpop.permute.xlu1 %309  }
  0xb9   :  { %415 = vst.msk [vmem:[%s783_s1 + $0x8] sm:$0xff] %vm301_vm8, %v310_v58  }
  0xbe   :  { %v332_v59 = vpop.permute.xlu0 %331  }
  0xbf   :  { %421 = vst.msk [vmem:[%s783_s1 + $0x18] sm:$0xff] %vm301_vm8, %v332_v59  }

// kernel: deepfm_forward.4
= control target key start
LH: loop header
LB: loop body
LE: loop exit
PB: predicated region body
PF: predicated region fallthrough
CT: control target
= control target key end

     0   :  { %s745_s21 = smov 0   ;;  %s747_s22 = smov 0   ;;  %s885_s0 = inlined_call_operand.vmem [shape: f32[32,256], index: 0, kind: input, shape index: {}]   ;;  %s886_s1 = inlined_call_operand.vmem [shape: f32[32,1], index: 1, kind: input, shape index: {}]   ;;  %s887_s2 = inlined_call_operand.vmem [shape: f32[32,1], index: 2, kind: input, shape index: {}]   ;;  %s888_s3 = inlined_call_operand.vmem [shape: f32[32,32], index: 3, kind: input, shape index: {}]   ;;  %s889_s4 = inlined_call_operand.vmem [shape: f32[32,1], index: 4, kind: input, shape index: {}]   ;;  %s890_s5 = inlined_call_operand.vmem [shape: f32[32,256], index: 5, kind: output, shape index: {0}]   ;;  %s891_s6 = inlined_call_operand.vmem [shape: f32[2,64,1], index: 6, kind: output, shape index: {1}]  }
   0x1   :  { %s749_s23 = smov 0  }
   0x2 LB: > { %s761_s24 = sadd.s32 4294967295, %s707_s23   ;;  %s764_s25 = sadd.s32 1, %s707_s23   ;;  %s707_s23 = sphi %s749_s23, %s895_s23   ;;  %s703_s22 = sphi %s747_s22, %s894_s22   ;;  %s699_s21 = sphi %s745_s21, %s893_s21  }
   0x3   : > { %s21_s26 = ssub.s32 %s707_s23, %s764_s25  ;;  %s24_s27 = sadd.s32 1, %s703_s22 }
   0x4   : > { %p22_p0 = scmp.eq.s32.totalorder %s21_s26, 0  ;;  %p31_p1 = scmp.ne.s32.totalorder %s703_s22, %s699_s21 }
   0x5   : > { %p32_p2 = scmp.eq.s32.totalorder %s707_s23, 0  ;;  %p145_p3 = scmp.eq.s32.totalorder %s761_s24, 1 }
   0x6   : > { %s774_s28 = scalar_select %p22_p0, %s703_s22, %s24_s27  }
   0x7   : > { %p33_p4 = por %p32_p2, %p31_p1  ;;  %p776_p5 = por %p145_p3, %p31_p1 }
   0x8   : > { %p627_p6 = scmp.ge.s32.totalorder %s707_s23, 2 }
   0xa   : > { %205 = sbr.rel (%p627_p6) target bundleno = 23 (0x17), region = 32 }
   0xf   : > { %208 = sbr.rel (!%p33_p4) target bundleno = 23 (0x17), region = 36  ;;  %s210_s30 = sand.u32 (%p33_p4), 1, %s703_s22  }
  0x10   : > { %s629_s7 = sshll.u32 (%p33_p4), %s707_s23, 3  ;;  %s628_s8 = sshll.u32 (%p33_p4), %s210_s30, 5 }
  0x11   : > { %s214_s11 = scalar_lea.vmem (%p33_p4), %s885_s0, %s629_s7  ;;  %s212_s12 = scalar_lea.vmem (%p33_p4), [#allocation2], %s628_s8 }
  0x12   : > { %v249_v0 = vld [vmem:[%s214_s11] sm:$0xff] (%p33_p4)  ;;  %v251_v1 = vld [vmem:[%s214_s11 + $0x10] sm:$0xff] (%p33_p4) }
  0x13   : > { %v253_v2 = vld [vmem:[%s214_s11 + $0x20] sm:$0xff] (%p33_p4)  ;;  %250 = vst [vmem:[%s212_s12] sm:$0xff] (%p33_p4), %v249_v0  ;;  %v255_v3 = vld [vmem:[%s214_s11 + $0x30] sm:$0xff] (%p33_p4) }
  0x14   : > { %252 = vst [vmem:[%s212_s12 + $0x8] sm:$0xff] %v251_v1 }
  0x15   : > { %254 = vst [vmem:[%s212_s12 + $0x10] sm:$0xff] %v253_v2 }
  0x16   : > { %256 = vst [vmem:[%s212_s12 + $0x18] sm:$0xff] %v255_v3 }
  0x17 PF: > { %p630_p7 = scmp.ge.s32.totalorder %s707_s23, 1  ;;  %p261_p8 = scmp.lt.s32.totalorder %s707_s23, 3 }
  0x19   : > { %p262_p9 = pnand %p630_p7, %p261_p8 }
  0x1a   : > { %s268_s19 = sand.u32 (!%p262_p9), 1, %s699_s21   ;;  %s639_s11 = sshll.u32 (!%p262_p9), %s761_s24, 7 }
  0x1b   : > { %265 = sbr.rel (%p262_p9) target bundleno = 440 (0x1b8), region = 74  ;;  %s825_s20 = sshll.u32 (!%p262_p9), %s268_s19, 5 }
  0x1c   : > { %s270_s23 = scalar_lea.vmem (!%p262_p9), [#allocation2], %s825_s20  ;;  %s842_s12 = scalar_lea.vmem (!%p262_p9), [#allocation3], %s825_s20 }
  0x1d   : > { %p301_p10 = scmp.lt.s32.totalorder (!%p262_p9), %s761_s24, 1 }
  0x20   : > { %v341_v4 = vld [vmem:[%s887_s2 + $0x18] sm:$0xff]  ;;  %v709_v6 = vmov 0   ;;  %v340_v7 = vld [vmem:[%s887_s2 + $0x10] sm:$0xff]  ;;  %v311_v9 = vld [vmem:[%s886_s1 + $0x8] sm:$0xff]  ;;  %vm394_vm0 = vcmask 261120   ;;  %v440_v41 = vlaneseq  ;;  %v443_v43 = vstv %s639_s11  ;;  %s302_s13 = scalar_select %p301_p10, %s761_s24, 1 }
  0x21   : > { %v313_v5 = vld [vmem:[%s886_s1 + $0x18] sm:$0xff]  ;;  %683 = vset.pattern.permute.xlu1 %v709_v6  ;;  %682 = vset.pattern.permute.xlu0 %v709_v6  ;;  %v312_v8 = vld [vmem:[%s886_s1 + $0x10] sm:$0xff]  ;;  %v310_v10 = vld [vmem:[%s886_s1] sm:$0xff]  ;;  %vm472_vm2 = vcmask 7168   ;;  %s641_s18 = sshll.u32 (%p776_p5), %s761_s24, 3 }
  0x22   : > { %359 = vperm.xlu1 %683, %v341_v4   ;;  %331 = vperm.xlu0 %682, %v313_v5   ;;  %v339_v11 = vld [vmem:[%s887_s2 + $0x8] sm:$0xff]  ;;  %v338_v12 = vld [vmem:[%s887_s2] sm:$0xff]  ;;  %v372_v15 = vld [vmem:[%s889_s4 + $0x10] sm:$0xff]  ;;  %v441_v42 = vand.u32 127, %v440_v41  ;;  %s644_s14 = sshll.u32 %s302_s13, 6 }
  0x23   : > { %684 = vset.pattern.permute.xlu2 %v709_v6  ;;  %v370_v13 = vld [vmem:[%s889_s4] sm:$0xff]  ;;  %v371_v14 = vld [vmem:[%s889_s4 + $0x8] sm:$0xff]  ;;  %v373_v16 = vld [vmem:[%s889_s4 + $0x18] sm:$0xff]  ;;  %s305_s17 = scalar_lea.vmem %s891_s6, %s644_s14 }
  0x24   : > { %354 = vperm.xlu2 %684, %v340_v7   ;;  %v309_v17 = vld [vmem:[%s270_s23 + $0x18] sm:$0xff]  ;;  %v308_v23 = vld [vmem:[%s270_s23 + $0x10] sm:$0xff]  ;;  %v307_v28 = vld [vmem:[%s270_s23 + $0x8] sm:$0xff]  ;;  %v444_v45 = vadd.s32 %v443_v43, %v441_v42 }
  0x25   : > { %v306_v29 = vld [vmem:[%s270_s23] sm:$0xff]  ;;  %v367_v38 = vld [vmem:[%s888_s3 + $0x8] sm:$0xff]  ;;  %v368_v39 = vld [vmem:[%s888_s3 + $0x10] sm:$0xff]  ;;  %s494_s23 = scalar_lea.vmem (%p776_p5), %s890_s5, %s641_s18 }
  0x26   : > { %v366_v37 = vld [vmem:[%s888_s3] sm:$0xff]  ;;  %v369_v40 = vld [vmem:[%s888_s3 + $0x18] sm:$0xff]  ;;  %vm445_vm1 = vcmp.lt.s32.totalorder %v444_v45, 200 }
  0x2a   : > { %326 = vperm.xlu0 %682, %v312_v8   ;;  %321 = vperm.xlu1 %683, %v311_v9  }
  0x2c   : > { %316 = vperm.xlu2 %684, %v310_v10  }
  0x32   : > { %349 = vperm.xlu0 %682, %v339_v11   ;;  %344 = vperm.xlu1 %683, %v338_v12  }
  0x34   : > { %376 = vperm.xlu2 %684, %v370_v13  }
  0x3a   : > { %381 = vperm.xlu0 %682, %v371_v14   ;;  %386 = vperm.xlu1 %683, %v372_v15  }
  0x3c   : > { %391 = vperm.xlu2 %684, %v373_v16  }
  0x7e   : > { %v355_v22 = vpop.permute.xlu2 %354 }
  0x86   : > { %v317_v30 = vpop.permute.xlu2 %316 }
  0x87   : > { %v334_v34 = vmul.f32 %v317_v30, %v306_v29 }
  0x8e   : > { %v377_v44 = vpop.permute.xlu2 %376 }
  0x94   : > { %v360_v18 = vpop.permute.xlu1 %359  ;;  %v332_v19 = vpop.permute.xlu0 %331 }
  0x95   : > { %v337_v20 = vmul.f32 %v332_v19, %v309_v17 }
  0x96   : > { %v392_v53 = vpop.permute.xlu2 %391 }
  0x97   : > { %v365_v21 = vadd.f32 %v360_v18, %v337_v20 }
  0x99   : > { %419 = vmatpush.msra.mxu0 %v365_v21  ;;  %645 = vmatpush.msra.mxu1 %v365_v21 }
  0x9a   : > { %646 = vmatpush.msra.mxu2 %v365_v21  ;;  %647 = vmatpush.msra.mxu3 %v365_v21 }
  0x9c   : > { %v327_v24 = vpop.permute.xlu0 %326  ;;  %v322_v25 = vpop.permute.xlu1 %321 }
  0x9d   : > { %v336_v26 = vmul.f32 %v327_v24, %v308_v23  ;;  %v335_v31 = vmul.f32 %v322_v25, %v307_v28 }
  0x9f   : > { %v364_v27 = vadd.f32 %v355_v22, %v336_v26 }
  0xa1   : > { %420 = vmatpush.msra.mxu0 %v364_v27  ;;  %648 = vmatpush.msra.mxu1 %v364_v27 }
  0xa2   : > { %649 = vmatpush.msra.mxu2 %v364_v27  ;;  %650 = vmatpush.msra.mxu3 %v364_v27 }
  0xa4   : > { %v350_v32 = vpop.permute.xlu0 %349  ;;  %v345_v33 = vpop.permute.xlu1 %344 }
  0xa5   : > { %v363_v35 = vadd.f32 %v350_v32, %v335_v31  ;;  %v362_v36 = vadd.f32 %v345_v33, %v334_v34 }
  0xa7   : > { %421 = vmatpush.msra.mxu0 %v363_v35  ;;  %651 = vmatpush.msra.mxu1 %v363_v35 }
  0xa8   : > { %652 = vmatpush.msra.mxu2 %v363_v35  ;;  %653 = vmatpush.msra.mxu3 %v363_v35 }
  0xa9   : > { %422 = vmatpush.msra.mxu0 %v362_v36  ;;  %654 = vmatpush.msra.mxu1 %v362_v36 }
  0xaa   : > { %655 = vmatpush.msra.mxu2 %v362_v36  ;;  %656 = vmatpush.msra.mxu3 %v362_v36 }
  0xab   : > { %635 = vmatmul.msk.f32.vlgmr.msra.gmra.mxu0 %vm394_vm0, %v366_v37  ;;  %636 = vmatmul.msk.f32.vlgmr.msra.gmra.mxu1 %vm394_vm0, %v367_v38 }
  0xac   : > { %637 = vmatmul.msk.f32.vlgmr.msra.gmra.mxu2 %vm394_vm0, %v368_v39  ;;  %638 = vmatmul.msk.f32.vlgmr.msra.gmra.mxu3 %vm394_vm0, %v369_v40  ;;  %v382_v46 = vpop.permute.xlu0 %381  ;;  %v387_v54 = vpop.permute.xlu1 %386 }
 0x128   : > { %v424_v47 = vpop.f32.mrf.mxu0  ;;  %v427_v48 = vpop.f32.mrf.mxu1 }
 0x129   : > { %v425_v49 = vadd.f32 %v424_v47, %v377_v44  ;;  %v428_v50 = vadd.f32 %v427_v48, %v382_v46 }
 0x12b   : > { %436 = vst [vmem:[%s842_s12] sm:$0xff] %v425_v49  ;;  %v449_v51 = vsel %vm445_vm1, %v428_v50, 0.0  ;;  %v448_v52 = vsel %vm445_vm1, %v425_v49, 0.0 }
 0x12c   : > { %437 = vst [vmem:[%s842_s12 + $0x8] sm:$0xff] %v428_v50  ;;  %454 = vadd.xlane.f32.xlu1 %v449_v51  ;;  %452 = vadd.xlane.f32.xlu0 %v448_v52  ;;  %v461_v60 = vmul.f32 %v449_v51, %v449_v51  ;;  %v460_v61 = vmul.f32 %v448_v52, %v448_v52 }
 0x12f   : > { %v430_v55 = vpop.f32.mrf.mxu2  ;;  %v433_v56 = vpop.f32.mrf.mxu3 }
 0x130   : > { %v431_v57 = vadd.f32 %v430_v55, %v387_v54  ;;  %v434_v58 = vadd.f32 %v433_v56, %v392_v53 }
 0x132   : > { %438 = vst [vmem:[%s842_s12 + $0x10] sm:$0xff] %v431_v57  ;;  %v450_v59 = vsel %vm445_vm1, %v431_v57, 0.0  ;;  %v451_v62 = vsel %vm445_vm1, %v434_v58, 0.0  ;;  %v529_v9 = vld [vmem:[%s842_s12] sm:$0xff] (%p776_p5) }
 0x133   : > { %439 = vst [vmem:[%s842_s12 + $0x18] sm:$0xff] %v434_v58  ;;  %456 = vadd.xlane.f32.xlu2 %v450_v59  ;;  %v463_v63 = vmul.f32 %v451_v62, %v451_v62  ;;  %v462_v0 = vmul.f32 %v450_v59, %v450_v59  ;;  %v531_v10 = vld [vmem:[%s842_s12 + $0x8] sm:$0xff] (%p776_p5) }
 0x134   : > { %466 = vadd.xlane.f32.xlu1 %v461_v60  ;;  %464 = vadd.xlane.f32.xlu0 %v460_v61  ;;  %530 = vst [vmem:[%s494_s23] sm:$0xff] (%p776_p5), %v529_v9 }
 0x135   : > { %532 = vst [vmem:[%s494_s23 + $0x10] sm:$0xff] (%p776_p5), %v531_v10 }
 0x139   : > { %v533_v11 = vld [vmem:[%s842_s12 + $0x10] sm:$0xff] (%p776_p5) }
 0x13a   : > { %v535_v12 = vld [vmem:[%s842_s12 + $0x18] sm:$0xff] (%p776_p5)  ;;  %534 = vst [vmem:[%s494_s23 + $0x20] sm:$0xff] (%p776_p5), %v533_v11 }
 0x13b   : > { %458 = vadd.xlane.f32.xlu2 %v451_v62  ;;  %536 = vst [vmem:[%s494_s23 + $0x30] sm:$0xff] (%p776_p5), %v535_v12 }
 0x13c   : > { %470 = vadd.xlane.f32.xlu0 %v463_v63 }
 0x143   : > { %468 = vadd.xlane.f32.xlu2 %v462_v0 }
 0x19f   : > { %v455_v1 = vpop.xlane.xlu1 %454  ;;  %v453_v2 = vpop.xlane.xlu0 %452 }
 0x1a0   : > { %474 = vst.msk [vmem:[%s305_s17 + $0x8] sm:$0xff] %vm472_vm2, %v455_v1 }
 0x1a1   : > { %473 = vst.msk [vmem:[%s305_s17] sm:$0xff] %vm472_vm2, %v453_v2 }
 0x1a6   : > { %v457_v3 = vpop.xlane.xlu2 %456 }
 0x1a7   : > { %475 = vst.msk [vmem:[%s305_s17 + $0x10] sm:$0xff] %vm472_vm2, %v457_v3  ;;  %v467_v4 = vpop.xlane.xlu1 %466  ;;  %v465_v5 = vpop.xlane.xlu0 %464 }
 0x1a8   : > { %478 = vst.msk [vmem:[%s305_s17 + $0x28] sm:$0xff] %vm472_vm2, %v467_v4 }
 0x1a9   : > { %477 = vst.msk [vmem:[%s305_s17 + $0x20] sm:$0xff] %vm472_vm2, %v465_v5 }
 0x1ae   : > { %v459_v6 = vpop.xlane.xlu2 %458 }
 0x1af   : > { %476 = vst.msk [vmem:[%s305_s17 + $0x18] sm:$0xff] %vm472_vm2, %v459_v6  ;;  %v471_v7 = vpop.xlane.xlu0 %470 }
 0x1b0   : > { %480 = vst.msk [vmem:[%s305_s17 + $0x38] sm:$0xff] %vm472_vm2, %v471_v7 }
 0x1b3   : > { %492 = sbr.rel (!%p776_p5) target bundleno = 440 (0x1b8), region = 82 }
 0x1b6   : > { %v469_v8 = vpop.xlane.xlu2 %468 }
 0x1b7   : > { %479 = vst.msk [vmem:[%s305_s17 + $0x30] sm:$0xff] %vm472_vm2, %v469_v8 }
 0x1b8 PF: > { %p14_p11 = scmp.ge.s32.totalorder %s764_s25, 4   ;;  %s893_s21 = smov %s703_s22 }
 0x1b9   : > { %s894_s22 = smov %s774_s28  ;;  %s895_s23 = smov %s764_s25 }
 0x1ba   :  { %16 = sbr.rel (!%p14_p11) target bundleno = 2 (0x2), region = 163 }

// kernel: deepfm_forward.5
= control target key start
LH: loop header
LB: loop body
LE: loop exit
PB: predicated region body
PF: predicated region fallthrough
CT: control target
= control target key end

     0   :  { %9 = vsyncpa [#allocation4], 0  ;;  %s642_s0 = inlined_call_operand.vmem [shape: f32[32,256], index: 0, kind: input, shape index: {}]   ;;  %s643_s1 = inlined_call_operand.vmem [shape: f32[1,32], index: 1, kind: input, shape index: {}]   ;;  %s644_s2 = inlined_call_operand.vmem [shape: f32[1,256], index: 2, kind: input, shape index: {}]   ;;  %s645_s3 = inlined_call_operand.vmem [shape: f32[1,256], index: 3, kind: input, shape index: {}]   ;;  %s646_s4 = inlined_call_operand.hbm [shape: f32[1,256], index: 4, kind: output, shape index: {}]  }
   0x1   :  { %11 = vsyncpa [#allocation4 + $0x1], 0  ;;  %s536_s15 = smov 0   ;;  %s538_s16 = smov 0  }
   0x2   :  { %s540_s17 = smov 0   ;;  %s542_s18 = smov 0  }
   0x3 LB: > { %s557_s19 = sadd.s32 4294967295, %s509_s18   ;;  %s397_s20 = sadd.s32 4294967294, %s509_s18   ;;  %s509_s18 = sphi %s542_s18, %s652_s18   ;;  %s505_s17 = sphi %s540_s17, %s651_s17   ;;  %s501_s16 = sphi %s538_s16, %s650_s16   ;;  %s497_s15 = sphi %s536_s15, %s649_s15  }
   0x4   : > { %s561_s21 = sadd.s32 1, %s509_s18   ;;  %s24_s22 = sadd.s32 1, %s505_s17 }
   0x5   : > { %s21_s23 = ssub.s32 %s509_s18, %s561_s21  ;;  %p31_p0 = scmp.ne.s32.totalorder %s505_s17, %s501_s16 }
   0x6   : > { %p22_p1 = scmp.eq.s32.totalorder %s21_s23, 0  ;;  %p32_p2 = scmp.eq.s32.totalorder %s509_s18, 0 }
   0x7   : > { %p134_p3 = scmp.eq.s32.totalorder %s557_s19, 1  ;;  %p139_p4 = scmp.ne.s32.totalorder %s501_s16, %s497_s15 }
   0x8   : > { %s573_s24 = scalar_select %p22_p1, %s505_s17, %s24_s22  }
   0x9   : > { %p33_p5 = por %p32_p2, %p31_p0  ;;  %p575_p6 = por %p134_p3, %p31_p0 }
   0xa   : > { %p140_p7 = scmp.eq.s32.totalorder %s397_s20, 1  ;;  %p399_p9 = scmp.ge.s32.totalorder %s509_s18, 2 }
   0xc   : > { %p579_p8 = por %p140_p7, %p139_p4  ;;  %159 = sbr.rel (%p399_p9) target bundleno = 25 (0x19), region = 20 }
  0x11   : > { %162 = sbr.rel (!%p33_p5) target bundleno = 25 (0x19), region = 24  ;;  %s164_s27 = sand.u32 (%p33_p5), 1, %s505_s17  }
  0x12   : > { %s401_s28 = sshll.u32 (%p33_p5), %s509_s18, 3  ;;  %s400_s29 = sshll.u32 (%p33_p5), %s164_s27, 5 }
  0x13   : > { %s168_s6 = scalar_lea.vmem (%p33_p5), %s642_s0, %s401_s28  ;;  %s166_s7 = scalar_lea.vmem (%p33_p5), [#allocation2], %s400_s29 }
  0x14   : > { %v203_v0 = vld [vmem:[%s168_s6] sm:$0xff] (%p33_p5)  ;;  %v205_v1 = vld [vmem:[%s168_s6 + $0x10] sm:$0xff] (%p33_p5) }
  0x15   : > { %v207_v2 = vld [vmem:[%s168_s6 + $0x20] sm:$0xff] (%p33_p5)  ;;  %204 = vst [vmem:[%s166_s7] sm:$0xff] (%p33_p5), %v203_v0  ;;  %v209_v3 = vld [vmem:[%s168_s6 + $0x30] sm:$0xff] (%p33_p5) }
  0x16   : > { %206 = vst [vmem:[%s166_s7 + $0x8] sm:$0xff] %v205_v1 }
  0x17   : > { %208 = vst [vmem:[%s166_s7 + $0x10] sm:$0xff] %v207_v2 }
  0x18   : > { %210 = vst [vmem:[%s166_s7 + $0x18] sm:$0xff] %v209_v3 }
  0x19 PF: > { %p402_p10 = scmp.ge.s32.totalorder %s509_s18, 1  ;;  %p227_p11 = scmp.lt.s32.totalorder %s509_s18, 3 }
  0x1b   : > { %p228_p12 = pnand %p402_p10, %p227_p11 }
  0x1c   : > { %s594_s8 = sand.u32 (!%p228_p12), 1, %s501_s16   ;;  %p264_p13 = scmp.lt.s32.totalorder (!%p228_p12), %s557_s19, 1 }
  0x1d   : > { %231 = sbr.rel (%p228_p12) target bundleno = 175 (0xaf), region = 70  ;;  %s403_s9 = sshll.u32 (!%p228_p12), %s594_s8, 5 }
  0x1e   : > { %s236_s10 = scalar_lea.vmem (!%p228_p12), [#allocation2], %s403_s9  ;;  %s314_s5 = scalar_lea.hbm (!%p228_p12), %s646_s4, %s557_s19 }
  0x1f   : > { %s263_s6 = scalar_lea.vmem (!%p228_p12), [#allocation3], %s594_s8  ;;  %s318_s9 = sshll.u32 (!%p228_p12), %s314_s5, 4  ;;  %s319_s9 = int_to_ptr.hbm [resolvable:$true] %s318_s9 }
  0x20   : > { %s316_s7 = sshll.u32 (!%p228_p12), %s263_s6, 4  ;;  %s461_s11 = sshra.s32 (!%p228_p12), %s319_s9, 4  ;;  %s317_s7 = int_to_ptr.vmem [resolvable:$true] %s316_s7  ;;  %s462_s11 = int_to_ptr.hbm [resolvable:$true] %s461_s11 }
  0x21   : > { %s463_s12 = scalar_lea.hbm (!%p228_p12), %s462_s11, 1  ;;  %s467_s14 = scalar_lea.hbm (!%p228_p12), %s646_s4, 2 }
  0x22   : > { %v276_v4 = vld [vmem:[%s236_s10 + $0x18] sm:$0xff]  ;;  %v275_v5 = vld [vmem:[%s236_s10 + $0x10] sm:$0xff]  ;;  %v274_v6 = vld [vmem:[%s236_s10 + $0x8] sm:$0xff]  ;;  %vm277_vm0 = vcmask 261120   ;;  %s265_s13 = scalar_select %p264_p13, %s557_s19, 1 }
  0x23   : > { %292 = vmatpush.msra.mxu0 %v276_v4  ;;  %v273_v7 = vld [vmem:[%s236_s10] sm:$0xff]  ;;  %s306_s10 = scalar_lea.sflag [#allocation4], %s594_s8  ;;  %p464_p0 = scmp.ne.s32.totalorder %s462_s11, %s463_s12 }
  0x24   : > { %v446_v8 = vld [vmem:[%s643_s1] ss:$0 sm:$0xff]  ;;  %s266_s22 = scalar_lea.vmem %s644_s2, %s265_s13  ;;  %s269_s28 = scalar_lea.vmem %s645_s3, %s265_s13 }
  0x25   : > { %293 = vmatpush.msra.mxu0 %v275_v5  ;;  %v300_v9 = vld [vmem:[%s266_s22] sm:$0x1]  ;;  %p465_p1 = pnand %p464_p0, %p575_p6  ;;  %p468_p3 = scmp.lt.s32.totalorder %s462_s11, %s646_s4 }
  0x26   : > { %v302_v11 = vld [vmem:[%s269_s28] sm:$0x1]  ;;  %p469_p4 = scmp.lt.s32.totalorder %s467_s14, %s463_s12 }
  0x27   : > { %294 = vmatpush.msra.mxu0 %v274_v6  ;;  %p466_p2 = pneg %p465_p1 }
  0x28   : > { %p470_p5 = por %p469_p4, %p468_p3 }
  0x29   : > { %295 = vmatpush.msra.mxu0 %v273_v7 }
  0x2a   : > { %404 = vmatmul.msk.f32.vlgmr.msra.gmra.mxu0 %vm277_vm0, %v446_v8  ;;  %p471_p7 = pnand %p470_p5, %p466_p2 }
  0xa7   : > { %v297_v10 = vpop.f32.mrf.mxu0 }
  0xa8   : > { %v301_v12 = vadd.f32 %v300_v9, %v297_v10 }
  0xaa   : > { %v303_v13 = vadd.f32 %v302_v11, %v301_v12 }
  0xac   : > { %304 = vst [vmem:[%s263_s6] sm:$0x1] %v303_v13 }
  0xad   : > { %474 = shalt.err (!%p471_p7)
}
  0xae   : > { %407 = dma.vmem_to_hbm [thread:$0]  (%p575_p6), %s317_s7, 16, %s319_s9, %s306_s10  }
  0xaf PF: > { %s330_s8 = sand.u32 1, %s497_s15   ;;  %p410_p10 = pnand %p399_p9, %p579_p8 }
  0xb0   : > { %s331_s23 = scalar_lea.sflag [#allocation4], %s330_s8 }
  0xb1   : > { %p411_p11 = pneg %p410_p10 }
  0xb3   : > { %492 = dma.done.wait (%p411_p11), %s331_s23, 16  }
  0xb4   : > { %494 = vsyncadd (%p411_p11), %s331_s23, 4294967280  ;;  %p14_p12 = scmp.ge.s32.totalorder %s561_s21, 4   ;;  %s649_s15 = smov %s501_s16 }
  0xb5   : > { %s650_s16 = smov %s505_s17  ;;  %s651_s17 = smov %s573_s24 }
  0xb6   : > { %s652_s18 = smov %s561_s21  ;;  %16 = sbr.rel (!%p14_p12) target bundleno = 3 (0x3), region = 120 }
  0xbb   :  { %336 = vsyncpa [#allocation4], 1 }
  0xbc   :  { %338 = vsyncpa [#allocation4 + $0x1], 1 }

// kernel: deepfm_forward.3
= control target key start
LH: loop header
LB: loop body
LE: loop exit
PB: predicated region body
PF: predicated region fallthrough
CT: control target
= control target key end

     0   :  { %s1393_s30 = smov 0   ;;  %s1395_s10 = smov 0   ;;  %s1814_s0 = inlined_call_operand.vmem [shape: f32[256,8], index: 0, kind: input, shape index: {}]   ;;  %s1815_s1 = inlined_call_operand.vmem [shape: f32[256,32], index: 1, kind: input, shape index: {}]   ;;  %s1816_s2 = inlined_call_operand.vmem [shape: f32[256,8], index: 2, kind: input, shape index: {}]   ;;  %s1817_s3 = inlined_call_operand.vmem [shape: f32[8,32], index: 3, kind: input, shape index: {}]   ;;  %s1818_s4 = inlined_call_operand.vmem [shape: f32[32,32], index: 4, kind: input, shape index: {}]   ;;  %s1819_s5 = inlined_call_operand.vmem [shape: f32[32,32], index: 5, kind: input, shape index: {}]   ;;  %s1820_s6 = inlined_call_operand.vmem [shape: f32[32,1], index: 6, kind: input, shape index: {}]   ;;  %s1821_s7 = inlined_call_operand.vmem [shape: f32[1,256], index: 7, kind: output, shape index: {0}]   ;;  %s1822_s8 = inlined_call_operand.vmem [shape: f32[32,256], index: 8, kind: output, shape index: {1}]   ;;  %s1823_s9 = inlined_call_operand.vmem [shape: f32[2,64,1], index: 9, kind: output, shape index: {2}]  }
   0x1   :  { %s1397_s11 = smov 0  }
   0x2 LB: > { %s1406_s12 = sadd.s32 4294967295, %s1339_s11   ;;  %s1408_s13 = sadd.s32 1, %s1339_s11   ;;  %s1339_s11 = sphi %s1397_s11, %s1827_s11   ;;  %s1335_s10 = sphi %s1395_s10, %s1826_s10   ;;  %s1331_s30 = sphi %s1393_s30, %s1825_s30  }
   0x3   : > { %s212_s14 = ssub.s32 %s1339_s11, %s1408_s13  ;;  %s215_s15 = sadd.s32 1, %s1335_s10 }
   0x4   : > { %p213_p0 = scmp.eq.s32.totalorder %s212_s14, 0  ;;  %p225_p1 = scmp.ne.s32.totalorder %s1335_s10, %s1331_s30 }
   0x5   : > { %p226_p2 = scmp.eq.s32.totalorder %s1406_s12, 1  ;;  %p1187_p3 = scmp.ge.s32.totalorder %s1339_s11, 1 }
   0x6   : > { %s1416_s16 = scalar_select %p213_p0, %s1335_s10, %s215_s15  }
   0x7   : > { %p1418_p4 = por %p226_p2, %p225_p1  ;;  %p315_p5 = scmp.lt.s32.totalorder %s1339_s11, 3 }
   0x9   : > { %p316_p6 = pnand %p1187_p3, %p315_p5 }
   0xa   : > { %s1189_s20 = sshll.u32 (!%p316_p6), %s1406_s12, 4  ;;  %s1283_s25 = sshll.u32 (!%p316_p6), %s1406_s12, 7 }
   0xb   : > { %319 = sbr.rel (%p316_p6) target bundleno = 660 (0x294), region = 48  ;;  %p369_p7 = scmp.lt.s32.totalorder (!%p316_p6), %s1189_s20, 31 }
   0xc   : > { %s358_s26 = sand.u32 (!%p316_p6), 1, %s1331_s30   ;;  %p386_p8 = scmp.lt.s32.totalorder (!%p316_p6), %s1406_s12, 1 }
  0x10   : > { %v410_v0 = vld [vmem:[%s1817_s3] sm:$0xff]  ;;  %s1829_s20 = smov (!%p369_p7, %s1189_s20), 31  ;;  %vm411_vm0 = vcmask 64512   ;;  %v560_v48 = vld [vmem:[%s1818_s4 + $0x18] sm:$0xff]  ;;  %v559_v49 = vld [vmem:[%s1818_s4 + $0x10] sm:$0xff]  ;;  %vm561_vm1 = vcmask 261120  }
  0x11   : > { %475 = vmatpush.msra.mxu0 %v410_v0  ;;  %s1426_s21 = sshll.u32 %s1829_s20, 3  ;;  %622 = vmatpush.msra.mxu1 %v560_v48  ;;  %v558_v51 = vld [vmem:[%s1818_s4 + $0x8] sm:$0xff]  ;;  %v557_v52 = vld [vmem:[%s1818_s4] sm:$0xff]  ;;  %vm988_vm3 = vcmask 7168   ;;  %s1285_s22 = sshll.u32 (%p1418_p4), %s1406_s12, 3 }
  0x12   : > { %s1432_s24 = scalar_lea.vmem %s1814_s0, %s1426_s21  ;;  %s1438_s27 = scalar_lea.vmem %s1816_s2, %s1426_s21 }
  0x13   : > { %v394_v1 = vld [vmem:[%s1438_s27] sm:$0xff]  ;;  %v395_v3 = vld [vmem:[%s1438_s27 + $0x8] sm:$0xff]  ;;  %v396_v6 = vld [vmem:[%s1438_s27 + $0x10] sm:$0xff]  ;;  %623 = vmatpush.msra.mxu1 %v559_v49  ;;  %s387_s30 = scalar_select %p386_p8, %s1406_s12, 1 }
  0x14   : > { %v778_v2 = vld [vmem:[%s1432_s24] sm:$0xff]  ;;  %1197 = vmatmul.msk.f32.vlgmr.msra.gmra.mxu0 %vm411_vm0, %v394_v1  ;;  %v779_v5 = vld [vmem:[%s1432_s24 + $0x8] sm:$0xff]  ;;  %v780_v7 = vld [vmem:[%s1432_s24 + $0x10] sm:$0xff] }
  0x15   : > { %v1444_v4 = vmul.f32 %v778_v2, %v394_v1  ;;  %v1449_v8 = vmul.f32 %v779_v5, %v395_v3  ;;  %v1451_v9 = vmul.f32 %v780_v7, %v396_v6  ;;  %v397_v10 = vld [vmem:[%s1438_s27 + $0x18] sm:$0xff]  ;;  %v398_v13 = vld [vmem:[%s1438_s27 + $0x20] sm:$0xff]  ;;  %v399_v16 = vld [vmem:[%s1438_s27 + $0x28] sm:$0xff]  ;;  %624 = vmatpush.msra.mxu1 %v558_v51  ;;  %s1288_s29 = sshll.u32 %s387_s30, 6  ;;  %s388_s20 = scalar_lea.vmem %s1821_s7, %s387_s30 }
  0x16   : > { %v781_v11 = vld [vmem:[%s1432_s24 + $0x18] sm:$0xff]  ;;  %v782_v14 = vld [vmem:[%s1432_s24 + $0x20] sm:$0xff]  ;;  %v783_v17 = vld [vmem:[%s1432_s24 + $0x28] sm:$0xff]  ;;  %s393_s15 = scalar_lea.vmem %s1823_s9, %s1288_s29 }
  0x17   : > { %v1455_v12 = vmul.f32 %v781_v11, %v397_v10  ;;  %v1459_v15 = vmul.f32 %v782_v14, %v398_v13  ;;  %v1464_v18 = vmul.f32 %v783_v17, %v399_v16  ;;  %v400_v19 = vld [vmem:[%s1438_s27 + $0x30] sm:$0xff]  ;;  %v401_v22 = vld [vmem:[%s1438_s27 + $0x38] sm:$0xff]  ;;  %v402_v25 = vld [vmem:[%s1438_s27 + $0x40] sm:$0xff]  ;;  %625 = vmatpush.msra.mxu1 %v557_v52 }
  0x18   : > { %v784_v20 = vld [vmem:[%s1432_s24 + $0x30] sm:$0xff]  ;;  %v785_v23 = vld [vmem:[%s1432_s24 + $0x38] sm:$0xff]  ;;  %v786_v26 = vld [vmem:[%s1432_s24 + $0x40] sm:$0xff] }
  0x19   : > { %v1469_v21 = vmul.f32 %v784_v20, %v400_v19  ;;  %v1474_v24 = vmul.f32 %v785_v23, %v401_v22  ;;  %v1479_v27 = vmul.f32 %v786_v26, %v402_v25  ;;  %v403_v28 = vld [vmem:[%s1438_s27 + $0x48] sm:$0xff]  ;;  %v404_v31 = vld [vmem:[%s1438_s27 + $0x50] sm:$0xff]  ;;  %v405_v34 = vld [vmem:[%s1438_s27 + $0x58] sm:$0xff] }
  0x1a   : > { %v787_v29 = vld [vmem:[%s1432_s24 + $0x48] sm:$0xff]  ;;  %v788_v32 = vld [vmem:[%s1432_s24 + $0x50] sm:$0xff]  ;;  %v789_v35 = vld [vmem:[%s1432_s24 + $0x58] sm:$0xff] }
  0x1b   : > { %v1484_v30 = vmul.f32 %v787_v29, %v403_v28  ;;  %v1489_v33 = vmul.f32 %v788_v32, %v404_v31  ;;  %v1494_v36 = vmul.f32 %v789_v35, %v405_v34  ;;  %v406_v37 = vld [vmem:[%s1438_s27 + $0x60] sm:$0xff]  ;;  %v407_v40 = vld [vmem:[%s1438_s27 + $0x68] sm:$0xff]  ;;  %v408_v43 = vld [vmem:[%s1438_s27 + $0x70] sm:$0xff] }
  0x1c   : > { %1198 = vmatmul.msk.f32.gmra.mxu0 %vm411_vm0, %v395_v3  ;;  %v790_v38 = vld [vmem:[%s1432_s24 + $0x60] sm:$0xff]  ;;  %v791_v41 = vld [vmem:[%s1432_s24 + $0x68] sm:$0xff]  ;;  %v792_v44 = vld [vmem:[%s1432_s24 + $0x70] sm:$0xff] }
  0x1d   : > { %v1499_v39 = vmul.f32 %v790_v38, %v406_v37  ;;  %v1504_v42 = vmul.f32 %v791_v41, %v407_v40  ;;  %v1509_v45 = vmul.f32 %v792_v44, %v408_v43  ;;  %v409_v46 = vld [vmem:[%s1438_s27 + $0x78] sm:$0xff]  ;;  %s1188_s27 = sshll.u32 %s358_s26, 5 }
  0x1e   : > { %v793_v47 = vld [vmem:[%s1432_s24 + $0x78] sm:$0xff]  ;;  %s1536_s24 = scalar_lea.vmem %s1815_s1, %s1426_s21  ;;  %s1738_s28 = scalar_lea.vmem [#allocation2], %s1188_s27 }
  0x1f   : > { %v1520_v50 = vmul.f32 %v793_v47, %v409_v46  ;;  %v525_v53 = vld [vmem:[%s1536_s24] sm:$0xff]  ;;  %v526_v56 = vld [vmem:[%s1536_s24 + $0x8] sm:$0xff]  ;;  %v527_v59 = vld [vmem:[%s1536_s24 + $0x10] sm:$0xff]  ;;  %s1016_s21 = scalar_lea.vmem (%p1418_p4), %s1822_s8, %s1285_s22 }
  0x20   : > { %v528_v62 = vld [vmem:[%s1536_s24 + $0x18] sm:$0xff]  ;;  %v529_v1 = vld [vmem:[%s1536_s24 + $0x20] sm:$0xff]  ;;  %v530_v5 = vld [vmem:[%s1536_s24 + $0x28] sm:$0xff] }
  0x21   : > { %v532_v14 = vld [vmem:[%s1536_s24 + $0x38] sm:$0xff]  ;;  %v534_v23 = vld [vmem:[%s1536_s24 + $0x48] sm:$0xff] }
  0x22   : > { %v536_v32 = vld [vmem:[%s1536_s24 + $0x58] sm:$0xff]  ;;  %v538_v41 = vld [vmem:[%s1536_s24 + $0x68] sm:$0xff] }
  0x23   : > { %v540_v49 = vld [vmem:[%s1536_s24 + $0x78] sm:$0xff] }
  0x24   : > { %1199 = vmatmul.msk.f32.gmra.mxu0 %vm411_vm0, %v396_v6 }
  0x2c   : > { %1200 = vmatmul.msk.f32.gmra.mxu0 %vm411_vm0, %v397_v10  ;;  %v531_v10 = vld [vmem:[%s1536_s24 + $0x30] sm:$0xff] }
  0x34   : > { %1201 = vmatmul.msk.f32.gmra.mxu0 %vm411_vm0, %v398_v13 }
  0x3c   : > { %1202 = vmatmul.msk.f32.gmra.mxu0 %vm411_vm0, %v399_v16 }
  0x44   : > { %1203 = vmatmul.msk.f32.gmra.mxu0 %vm411_vm0, %v400_v19  ;;  %v533_v19 = vld [vmem:[%s1536_s24 + $0x40] sm:$0xff] }
  0x4c   : > { %1204 = vmatmul.msk.f32.gmra.mxu0 %vm411_vm0, %v401_v22 }
  0x54   : > { %1205 = vmatmul.msk.f32.gmra.mxu0 %vm411_vm0, %v402_v25 }
  0x5c   : > { %1206 = vmatmul.msk.f32.gmra.mxu0 %vm411_vm0, %v403_v28  ;;  %v535_v28 = vld [vmem:[%s1536_s24 + $0x50] sm:$0xff] }
  0x64   : > { %1207 = vmatmul.msk.f32.gmra.mxu0 %vm411_vm0, %v404_v31 }
  0x6c   : > { %1208 = vmatmul.msk.f32.gmra.mxu0 %vm411_vm0, %v405_v34 }
  0x74   : > { %1209 = vmatmul.msk.f32.gmra.mxu0 %vm411_vm0, %v406_v37  ;;  %v537_v37 = vld [vmem:[%s1536_s24 + $0x60] sm:$0xff] }
  0x7c   : > { %1210 = vmatmul.msk.f32.gmra.mxu0 %vm411_vm0, %v407_v40 }
  0x84   : > { %1211 = vmatmul.msk.f32.gmra.mxu0 %vm411_vm0, %v408_v43 }
  0x8c   : > { %1212 = vmatmul.msk.f32.gmra.mxu0 %vm411_vm0, %v409_v46  ;;  %v539_v46 = vld [vmem:[%s1536_s24 + $0x70] sm:$0xff] }
  0x91   : > { %v477_v54 = vpop.f32.mrf.mxu0 }
  0x92   : > { %v1539_v55 = vmul.f32 %v525_v53, %v477_v54 }
  0x94   : > { %1213 = vmatmul.msk.f32.vlgmr.msra.gmra.mxu1 %vm561_vm1, %v1539_v55 }
  0x99   : > { %v480_v57 = vpop.f32.mrf.mxu0 }
  0x9a   : > { %v1544_v58 = vmul.f32 %v526_v56, %v480_v57 }
  0x9c   : > { %1214 = vmatmul.msk.f32.gmra.mxu1 %vm561_vm1, %v1544_v58 }
  0xa1   : > { %v483_v60 = vpop.f32.mrf.mxu0 }
  0xa2   : > { %v1549_v61 = vmul.f32 %v527_v59, %v483_v60 }
  0xa4   : > { %1215 = vmatmul.msk.f32.gmra.mxu1 %vm561_vm1, %v1549_v61 }
  0xa9   : > { %v486_v63 = vpop.f32.mrf.mxu0 }
  0xaa   : > { %v1554_v0 = vmul.f32 %v528_v62, %v486_v63  ;;  %v887_v63 = vld [vmem:[%s1820_s6] sm:$0xff] }
  0xac   : > { %1216 = vmatmul.msk.f32.gmra.mxu1 %vm561_vm1, %v1554_v0 }
  0xb1   : > { %v489_v2 = vpop.f32.mrf.mxu0 }
  0xb2   : > { %v1559_v3 = vmul.f32 %v529_v1, %v489_v2  ;;  %v1341_v1 = vmov 0   ;;  %v883_v2 = vld [vmem:[%s1819_s5] sm:$0xff] }
  0xb3   : > { %1315 = vset.pattern.permute.xlu0 %v1341_v1  ;;  %1316 = vset.pattern.permute.xlu1 %v1341_v1 }
  0xb4   : > { %1217 = vmatmul.msk.f32.gmra.mxu1 %vm561_vm1, %v1559_v3  ;;  %893 = vperm.xlu0 %1315, %v887_v63  }
  0xb9   : > { %v492_v6 = vpop.f32.mrf.mxu0 }
  0xba   : > { %v1564_v7 = vmul.f32 %v530_v5, %v492_v6  ;;  %v888_v6 = vld [vmem:[%s1820_s6 + $0x8] sm:$0xff] }
  0xbc   : > { %1218 = vmatmul.msk.f32.gmra.mxu1 %vm561_vm1, %v1564_v7  ;;  %898 = vperm.xlu0 %1315, %v888_v6  }
  0xc1   : > { %v495_v11 = vpop.f32.mrf.mxu0 }
  0xc2   : > { %v1569_v13 = vmul.f32 %v531_v10, %v495_v11  ;;  %v884_v10 = vld [vmem:[%s1819_s5 + $0x8] sm:$0xff] }
  0xc4   : > { %1219 = vmatmul.msk.f32.gmra.mxu1 %vm561_vm1, %v1569_v13 }
  0xc9   : > { %v498_v16 = vpop.f32.mrf.mxu0 }
  0xca   : > { %v1574_v17 = vmul.f32 %v532_v14, %v498_v16 }
  0xcc   : > { %1220 = vmatmul.msk.f32.gmra.mxu1 %vm561_vm1, %v1574_v17 }
  0xd1   : > { %v501_v20 = vpop.f32.mrf.mxu0 }
  0xd2   : > { %v1579_v22 = vmul.f32 %v533_v19, %v501_v20  ;;  %v885_v19 = vld [vmem:[%s1819_s5 + $0x10] sm:$0xff] }
  0xd4   : > { %1221 = vmatmul.msk.f32.gmra.mxu1 %vm561_vm1, %v1579_v22 }
  0xd9   : > { %v504_v25 = vpop.f32.mrf.mxu0 }
  0xda   : > { %v1584_v26 = vmul.f32 %v534_v23, %v504_v25  ;;  %v886_v23 = vld [vmem:[%s1819_s5 + $0x18] sm:$0xff] }
  0xdc   : > { %1222 = vmatmul.msk.f32.gmra.mxu1 %vm561_vm1, %v1584_v26 }
  0xe1   : > { %v507_v29 = vpop.f32.mrf.mxu0 }
  0xe2   : > { %v1589_v31 = vmul.f32 %v535_v28, %v507_v29  ;;  %v889_v28 = vld [vmem:[%s1820_s6 + $0x10] sm:$0xff] }
  0xe3   : > { %903 = vperm.xlu1 %1316, %v889_v28   ;;  %v1342_v28 = vmov 1.0  }
  0xe4   : > { %1223 = vmatmul.msk.f32.gmra.mxu1 %vm561_vm1, %v1589_v31 }
  0xe9   : > { %v510_v34 = vpop.f32.mrf.mxu0 }
  0xea   : > { %v1594_v35 = vmul.f32 %v536_v32, %v510_v34  ;;  %v890_v32 = vld [vmem:[%s1820_s6 + $0x18] sm:$0xff] }
  0xeb   : > { %908 = vperm.xlu1 %1316, %v890_v32  }
  0xec   : > { %1224 = vmatmul.msk.f32.gmra.mxu1 %vm561_vm1, %v1594_v35 }
  0xf1   : > { %v513_v38 = vpop.f32.mrf.mxu0 }
  0xf2   : > { %v1599_v40 = vmul.f32 %v537_v37, %v513_v38 }
  0xf4   : > { %1225 = vmatmul.msk.f32.gmra.mxu1 %vm561_vm1, %v1599_v40 }
  0xf9   : > { %v516_v43 = vpop.f32.mrf.mxu0 }
  0xfa   : > { %v1604_v44 = vmul.f32 %v538_v41, %v516_v43 }
  0xfc   : > { %1226 = vmatmul.msk.f32.gmra.mxu1 %vm561_vm1, %v1604_v44 }
 0x101   : > { %v519_v47 = vpop.f32.mrf.mxu0 }
 0x102   : > { %v555_v48 = vmul.f32 %v539_v46, %v519_v47 }
 0x104   : > { %1227 = vmatmul.msk.f32.gmra.mxu1 %vm561_vm1, %v555_v48 }
 0x109   : > { %v522_v51 = vpop.f32.mrf.mxu0 }
 0x10a   : > { %v556_v52 = vmul.f32 %v540_v49, %v522_v51 }
 0x10c   : > { %1228 = vmatmul.msk.f32.gmra.mxu1 %vm561_vm1, %v556_v52  ;;  %1263 = vmatpush.xpose.msk.msra.mxu2 %vm561_vm1, %v556_v52 }
 0x110   : > { %1264 = vmatpush.xpose.msk.msra.mxu2 %vm561_vm1, %v555_v48 }
 0x111   : > { %v1614_v53 = vpop.f32.mrf.mxu1 }
 0x114   : > { %1265 = vmatpush.xpose.msk.msra.mxu2 %vm561_vm1, %v1604_v44 }
 0x118   : > { %1266 = vmatpush.xpose.msk.msra.mxu2 %vm561_vm1, %v1599_v40 }
 0x119   : > { %v1620_v54 = vpop.f32.mrf.mxu1 }
 0x11c   : > { %1267 = vmatpush.xpose.msk.msra.mxu2 %vm561_vm1, %v1594_v35 }
 0x120   : > { %1268 = vmatpush.xpose.msk.msra.mxu2 %vm561_vm1, %v1589_v31 }
 0x121   : > { %v1626_v56 = vpop.f32.mrf.mxu1 }
 0x124   : > { %1269 = vmatpush.xpose.msk.msra.mxu2 %vm561_vm1, %v1584_v26 }
 0x128   : > { %1270 = vmatpush.xpose.msk.msra.mxu2 %vm561_vm1, %v1579_v22 }
 0x129   : > { %v1632_v57 = vpop.f32.mrf.mxu1 }
 0x12c   : > { %1271 = vmatpush.xpose.msk.msra.mxu2 %vm561_vm1, %v1574_v17 }
 0x130   : > { %1272 = vmatpush.xpose.msk.msra.mxu2 %vm561_vm1, %v1569_v13 }
 0x131   : > { %v1638_v59 = vpop.f32.mrf.mxu1 }
 0x134   : > { %1273 = vmatpush.xpose.msk.msra.mxu2 %vm561_vm1, %v1564_v7 }
 0x138   : > { %1274 = vmatpush.xpose.msk.msra.mxu2 %vm561_vm1, %v1559_v3 }
 0x139   : > { %v1644_v60 = vpop.f32.mrf.mxu1 }
 0x13c   : > { %1275 = vmatpush.xpose.msk.msra.mxu2 %vm561_vm1, %v1554_v0 }
 0x140   : > { %1276 = vmatpush.xpose.msk.msra.mxu2 %vm561_vm1, %v1549_v61 }
 0x141   : > { %v645_v62 = vpop.f32.mrf.mxu1 }
 0x144   : > { %1277 = vmatpush.xpose.msk.msra.mxu2 %vm561_vm1, %v1544_v58 }
 0x148   : > { %1278 = vmatpush.xpose.msk.msra.mxu2 %vm561_vm1, %v1539_v55 }
 0x149   : > { %v648_v5 = vpop.f32.mrf.mxu1 }
 0x14b   : > { %1279 = vmatmul.msk.f32.vlgmr.msra.gmra.mxu2 %vm561_vm1, %v883_v2 }
 0x151   : > { %v651_v11 = vpop.f32.mrf.mxu1 }
 0x153   : > { %1280 = vmatmul.msk.f32.gmra.mxu2 %vm561_vm1, %v884_v10 }
 0x159   : > { %v654_v14 = vpop.f32.mrf.mxu1 }
 0x15b   : > { %1281 = vmatmul.msk.f32.gmra.mxu2 %vm561_vm1, %v885_v19 }
 0x161   : > { %v657_v16 = vpop.f32.mrf.mxu1 }
 0x163   : > { %1282 = vmatmul.msk.f32.gmra.mxu2 %vm561_vm1, %v886_v23 }
 0x169   : > { %v660_v20 = vpop.f32.mrf.mxu1 }
 0x16a   : > { %v686_v63 = vsub.f32 %v660_v20, %v1594_v35 }
 0x16c   : > { %v702_v2 = vmul.f32 %v686_v63, %v1594_v35  ;;  %v681_v35 = vsub.f32 %v645_v62, %v1569_v13 }
 0x171   : > { %v663_v25 = vpop.f32.mrf.mxu1 }
 0x172   : > { %v687_v49 = vsub.f32 %v663_v25, %v1599_v40 }
 0x174   : > { %v703_v1 = vmul.f32 %v687_v49, %v1599_v40  ;;  %v682_v40 = vsub.f32 %v648_v5, %v1574_v17 }
 0x179   : > { %v666_v29 = vpop.f32.mrf.mxu1 }
 0x17a   : > { %v688_v46 = vsub.f32 %v666_v29, %v1604_v44 }
 0x17c   : > { %v704_v51 = vmul.f32 %v688_v46, %v1604_v44  ;;  %v683_v44 = vsub.f32 %v651_v11, %v1579_v22  ;;  %v697_v11 = vmul.f32 %v681_v35, %v1569_v13  ;;  %v677_v13 = vsub.f32 %v1626_v56, %v1549_v61 }
 0x181   : > { %v669_v34 = vpop.f32.mrf.mxu1 }
 0x182   : > { %v689_v41 = vsub.f32 %v669_v34, %v555_v48 }
 0x184   : > { %v705_v47 = vmul.f32 %v689_v41, %v555_v48  ;;  %v684_v48 = vsub.f32 %v654_v14, %v1584_v26  ;;  %v698_v14 = vmul.f32 %v682_v40, %v1574_v17  ;;  %v678_v17 = vsub.f32 %v1632_v57, %v1554_v0 }
 0x185   : > { %v956_v57 = vlaneseq }
 0x186   : > { %v700_v10 = vmul.f32 %v684_v48, %v1584_v26  ;;  %v679_v26 = vsub.f32 %v1638_v59, %v1559_v3  ;;  %v693_v59 = vmul.f32 %v677_v13, %v1549_v61 }
 0x187   : > { %v957_v56 = vand.u32 127, %v956_v57 }
 0x188   : > { %v695_v62 = vmul.f32 %v679_v26, %v1559_v3  ;;  %v675_v3 = vsub.f32 %v1614_v53, %v1539_v55 }
 0x189   : > { %v672_v37 = vpop.f32.mrf.mxu1 }
 0x18a   : > { %v690_v38 = vsub.f32 %v672_v37, %v556_v52  ;;  %v691_v19 = vmul.f32 %v675_v3, %v1539_v55 }
 0x18c   : > { %v706_v43 = vmul.f32 %v690_v38, %v556_v52  ;;  %v685_v52 = vsub.f32 %v657_v16, %v1589_v31  ;;  %v699_v16 = vmul.f32 %v683_v44, %v1579_v22 }
 0x18e   : > { %1229 = vmatpush.xpose.msk.msra.mxu3 %vm561_vm1, %v706_v43  ;;  %v701_v6 = vmul.f32 %v685_v52, %v1589_v31  ;;  %v680_v31 = vsub.f32 %v1644_v60, %v1564_v7  ;;  %v694_v60 = vmul.f32 %v678_v17, %v1554_v0  ;;  %v959_v0 = vstv %s1283_s25 }
 0x18f   : > { %v960_v61 = vadd.s32 %v959_v0, %v957_v56 }
 0x190   : > { %v696_v22 = vmul.f32 %v680_v31, %v1564_v7  ;;  %v676_v7 = vsub.f32 %v1620_v54, %v1544_v58  ;;  %v894_v54 = vpop.permute.xlu0 %893 }
 0x191   : > { %vm961_vm2 = vcmp.lt.s32.totalorder %v960_v61, 200 }
 0x192   : > { %1230 = vmatpush.xpose.msk.msra.mxu3 %vm561_vm1, %v705_v47  ;;  %v692_v5 = vmul.f32 %v676_v7, %v1544_v58 }
 0x196   : > { %1231 = vmatpush.xpose.msk.msra.mxu3 %vm561_vm1, %v704_v51 }
 0x198   : > { %v899_v53 = vpop.permute.xlu0 %898 }
 0x19a   : > { %1232 = vmatpush.xpose.msk.msra.mxu3 %vm561_vm1, %v703_v1 }
 0x19e   : > { %1233 = vmatpush.xpose.msk.msra.mxu3 %vm561_vm1, %v702_v2 }
 0x1a2   : > { %1234 = vmatpush.xpose.msk.msra.mxu3 %vm561_vm1, %v701_v6 }
 0x1a6   : > { %1235 = vmatpush.xpose.msk.msra.mxu3 %vm561_vm1, %v700_v10 }
 0x1aa   : > { %1236 = vmatpush.xpose.msk.msra.mxu3 %vm561_vm1, %v699_v16 }
 0x1ae   : > { %1237 = vmatpush.xpose.msk.msra.mxu3 %vm561_vm1, %v698_v14 }
 0x1b2   : > { %1238 = vmatpush.xpose.msk.msra.mxu3 %vm561_vm1, %v697_v11 }
 0x1b6   : > { %1239 = vmatpush.xpose.msk.msra.mxu3 %vm561_vm1, %v696_v22 }
 0x1ba   : > { %1240 = vmatpush.xpose.msk.msra.mxu3 %vm561_vm1, %v695_v62 }
 0x1be   : > { %1241 = vmatpush.xpose.msk.msra.mxu3 %vm561_vm1, %v694_v60 }
 0x1c2   : > { %1242 = vmatpush.xpose.msk.msra.mxu3 %vm561_vm1, %v693_v59 }
 0x1c6   : > { %1243 = vmatpush.xpose.msk.msra.mxu3 %vm561_vm1, %v692_v5 }
 0x1ca   : > { %1244 = vmatpush.xpose.msk.msra.mxu3 %vm561_vm1, %v691_v19 }
 0x1cd   : > { %1245 = vmatmul.msk.f32.vlgmr.msra.gmra.mxu3 %vm561_vm1, %v1342_v28 }
 0x1ce   : > { %1246 = vmatpush.xpose.msk.msrb.mxu3 %vm411_vm0, %v1520_v50  ;;  %v940_v20 = vpop.f32.mrf.mxu2 }
 0x1cf   : > { %v941_v58 = vadd.f32 %v940_v20, %v894_v54 }
 0x1d1   : > { %952 = vst [vmem:[%s1738_s28] sm:$0xff] %v941_v58  ;;  %v964_v55 = vsel %vm961_vm2, %v941_v58, 0.0 }
 0x1d2   : > { %1247 = vmatpush.xpose.msk.msrb.mxu3 %vm411_vm0, %v1509_v45  ;;  %968 = vadd.xlane.f32.xlu2 %v964_v55  ;;  %v976_v25 = vmul.f32 %v964_v55, %v964_v55 }
 0x1d6   : > { %1248 = vmatpush.xpose.msk.msrb.mxu3 %vm411_vm0, %v1504_v42  ;;  %v943_v50 = vpop.f32.mrf.mxu2 }
 0x1d7   : > { %v944_v23 = vadd.f32 %v943_v50, %v899_v53 }
 0x1d8   : > { %v1051_v49 = vld [vmem:[%s1738_s28] sm:$0xff] (%p1418_p4) }
 0x1d9   : > { %953 = vst [vmem:[%s1738_s28 + $0x8] sm:$0xff] %v944_v23  ;;  %v965_v45 = vsel %vm961_vm2, %v944_v23, 0.0 }
 0x1da   : > { %1249 = vmatpush.xpose.msk.msrb.mxu3 %vm411_vm0, %v1499_v39  ;;  %970 = vadd.xlane.f32.xlu2 %v965_v45  ;;  %v904_v39 = vpop.permute.xlu1 %903  ;;  %v977_v42 = vmul.f32 %v965_v45, %v965_v45  ;;  %1052 = vst [vmem:[%s1016_s21] sm:$0xff] (%p1418_p4), %v1051_v49 }
 0x1de   : > { %1250 = vmatpush.xpose.msk.msrb.mxu3 %vm411_vm0, %v1494_v36  ;;  %v946_v29 = vpop.f32.mrf.mxu2 }
 0x1df   : > { %v947_v32 = vadd.f32 %v946_v29, %v904_v39 }
 0x1e0   : > { %v1053_v51 = vld [vmem:[%s1738_s28 + $0x8] sm:$0xff] (%p1418_p4) }
 0x1e1   : > { %954 = vst [vmem:[%s1738_s28 + $0x10] sm:$0xff] %v947_v32  ;;  %v966_v36 = vsel %vm961_vm2, %v947_v32, 0.0 }
 0x1e2   : > { %1251 = vmatpush.xpose.msk.msrb.mxu3 %vm411_vm0, %v1489_v33  ;;  %980 = vadd.xlane.f32.xlu2 %v976_v25  ;;  %v909_v33 = vpop.permute.xlu1 %908  ;;  %v978_v34 = vmul.f32 %v966_v36, %v966_v36  ;;  %1054 = vst [vmem:[%s1016_s21 + $0x10] sm:$0xff] (%p1418_p4), %v1053_v51 }
 0x1e3   : > { %972 = vadd.xlane.f32.xlu0 %v966_v36 }
 0x1e6   : > { %1252 = vmatpush.xpose.msk.msrb.mxu3 %vm411_vm0, %v1484_v30  ;;  %v949_v37 = vpop.f32.mrf.mxu2 }
 0x1e7   : > { %v950_v30 = vadd.f32 %v949_v37, %v909_v33 }
 0x1e8   : > { %v1055_v63 = vld [vmem:[%s1738_s28 + $0x10] sm:$0xff] (%p1418_p4) }
 0x1e9   : > { %955 = vst [vmem:[%s1738_s28 + $0x18] sm:$0xff] %v950_v30 }
 0x1ea   : > { %1253 = vmatpush.xpose.msk.msrb.mxu3 %vm411_vm0, %v1479_v27  ;;  %982 = vadd.xlane.f32.xlu2 %v977_v42  ;;  %v967_v27 = vsel %vm961_vm2, %v950_v30, 0.0  ;;  %1056 = vst [vmem:[%s1016_s21 + $0x20] sm:$0xff] (%p1418_p4), %v1055_v63 }
 0x1eb   : > { %974 = vadd.xlane.f32.xlu1 %v967_v27  ;;  %v979_v38 = vmul.f32 %v967_v27, %v967_v27 }
 0x1ee   : > { %1254 = vmatpush.xpose.msk.msrb.mxu3 %vm411_vm0, %v1474_v24 }
 0x1f0   : > { %v1057_v1 = vld [vmem:[%s1738_s28 + $0x18] sm:$0xff] (%p1418_p4) }
 0x1f1   : > { %1058 = vst [vmem:[%s1016_s21 + $0x30] sm:$0xff] (%p1418_p4), %v1057_v1 }
 0x1f2   : > { %1255 = vmatpush.xpose.msk.msrb.mxu3 %vm411_vm0, %v1469_v21  ;;  %984 = vadd.xlane.f32.xlu2 %v978_v34 }
 0x1f6   : > { %1256 = vmatpush.xpose.msk.msrb.mxu3 %vm411_vm0, %v1464_v18 }
 0x1fa   : > { %1257 = vmatpush.xpose.msk.msrb.mxu3 %vm411_vm0, %v1459_v15  ;;  %986 = vadd.xlane.f32.xlu2 %v979_v38 }
 0x1fe   : > { %1258 = vmatpush.xpose.msk.msrb.mxu3 %vm411_vm0, %v1455_v12 }
 0x202   : > { %1259 = vmatpush.xpose.msk.msrb.mxu3 %vm411_vm0, %v1451_v9 }
 0x206   : > { %1260 = vmatpush.xpose.msk.msrb.mxu3 %vm411_vm0, %v1449_v8 }
 0x20a   : > { %1261 = vmatpush.xpose.msk.msrb.mxu3 %vm411_vm0, %v1444_v4 }
 0x20d   : > { %1262 = vmatmul.msk.f32.vlgmr.msrb.gmra.mxu3 %vm411_vm0, %v1342_v28 }
 0x245   : > { %v969_v12 = vpop.xlane.xlu2 %968 }
 0x246   : > { %989 = vst.msk [vmem:[%s393_s15] sm:$0xff] %vm988_vm3, %v969_v12 }
 0x24d   : > { %v971_v9 = vpop.xlane.xlu2 %970 }
 0x24e   : > { %990 = vst.msk [vmem:[%s393_s15 + $0x8] sm:$0xff] %vm988_vm3, %v971_v9 }
 0x250   : > { %v775_v41 = vpop.f32.mrf.mxu3 }
 0x251   : > { %v880_v43 = vmul.f32 0.5, %v775_v41 }
 0x255   : > { %v981_v8 = vpop.xlane.xlu2 %980 }
 0x256   : > { %993 = vst.msk [vmem:[%s393_s15 + $0x20] sm:$0xff] %vm988_vm3, %v981_v8  ;;  %v973_v15 = vpop.xlane.xlu0 %972 }
 0x257   : > { %991 = vst.msk [vmem:[%s393_s15 + $0x10] sm:$0xff] %vm988_vm3, %v973_v15 }
 0x25d   : > { %v983_v4 = vpop.xlane.xlu2 %982 }
 0x25e   : > { %994 = vst.msk [vmem:[%s393_s15 + $0x28] sm:$0xff] %vm988_vm3, %v983_v4  ;;  %v975_v21 = vpop.xlane.xlu1 %974 }
 0x25f   : > { %992 = vst.msk [vmem:[%s393_s15 + $0x18] sm:$0xff] %vm988_vm3, %v975_v21 }
 0x265   : > { %v985_v18 = vpop.xlane.xlu2 %984 }
 0x266   : > { %995 = vst.msk [vmem:[%s393_s15 + $0x30] sm:$0xff] %vm988_vm3, %v985_v18 }
 0x26d   : > { %v987_v24 = vpop.xlane.xlu2 %986 }
 0x26e   : > { %996 = vst.msk [vmem:[%s393_s15 + $0x38] sm:$0xff] %vm988_vm3, %v987_v24 }
 0x28f   : > { %1014 = sbr.rel (!%p1418_p4) target bundleno = 660 (0x294), region = 56 }
 0x290   : > { %v877_v46 = vpop.f32.mrf.mxu3 }
 0x291   : > { %v881_v47 = vadd.f32 %v880_v43, %v877_v46 }
 0x293   : > { %882 = vst [vmem:[%s388_s20] sm:$0x1] %v881_v47 }
 0x294 PF: > { %p17_p9 = scmp.ge.s32.totalorder %s1408_s13, 4   ;;  %s1825_s30 = smov %s1335_s10 }
 0x295   : > { %s1826_s10 = smov %s1416_s16  ;;  %s1827_s11 = smov %s1408_s13 }
 0x296   :  { %19 = sbr.rel (!%p17_p9) target bundleno = 2 (0x2), region = 146 }

</bundles_post_ra>
